<compile_context>
chip_gen: v7x
topology: tpu7x:2x2x1
jax: 0.10.0
libtpu: 0.0.40
codegen_flags: <defaults>
</compile_context>

<pallas_src>
import math

import jax
import jax.numpy as jnp
from jax import lax
from jax.experimental import pallas as pl
from jax.experimental.pallas import tpu as pltpu


# Below this many bytes of tok_emb, pallas_call launch overhead + step cost
# exceed the work; XLA's GEMV is already bandwidth-bound.
_MIN_PALLAS_BYTES = 1 << 20


def _score_kernel(proj_ref, tok_ref, score_ref):
    # proj_ref  : (1, D)   f32 Linear(cls) projection (grid-invariant, resident)
    # tok_ref   : (Tt, D)  token-embedding tile (native dtype)
    # score_ref : (1, Tt)  lane-dense per-token attention scores, f32
    #
    # score[t] = sum_d proj[d] * tok[t, d]            (single MXU contraction)
    tok = tok_ref[...].astype(jnp.float32)  # no-op for f32; keeps bf16 accum in f32
    score_ref[...] = lax.dot_general(
        proj_ref[...], tok,
        dimension_numbers=(((1,), (1,)), ((), ())),
        preferred_element_type=jnp.float32)


def _pick_t_tile(D, itemsize):
    # Double-buffered token tile must fit comfortably in scoped VMEM on every
    # generation (v5e default 16 MiB scoped; v7x 64 MiB total):
    #   2 * t_tile * D * itemsize <= ~12 MiB  ->  one buffer <= 6 MiB.
    budget_per_buffer = 6 * 1024 * 1024
    t_tile = budget_per_buffer // max(D * itemsize, 1)
    t_tile = min(1024, t_tile)                 # >=1024 rows ~ HBM-roofline tiles
    t_tile = max(128, (t_tile // 128) * 128)   # multiple of 128 -> lane-dense stores
    return t_tile


def attn_scores_pallas(cls_emb, tok_emb, weight, bias):
    """attn_score = sum(Linear(cls) * tok, -1).  Returns (T,) float32 scores.

    cls_emb: (1, D), tok_emb: (T, D), weight: (D, D) [PyTorch (out, in)],
    bias: (D,).
    """
    T, D = tok_emb.shape

    # Grid-invariant Linear(cls) projection, hoisted out of the kernel and
    # computed once with plain XLA (tiny GEMV).  Kept in f32.
    proj = (cls_emb.astype(jnp.float32) @ weight.astype(jnp.float32).T
            + bias.astype(jnp.float32)).reshape(1, D)

    itemsize = jnp.dtype(tok_emb.dtype).itemsize
    if T * D * itemsize < _MIN_PALLAS_BYTES:
        # Small-shape fallback: XLA GEMV, no kernel launch, no padding.
        return tok_emb.astype(jnp.float32) @ proj[0]

    t_tile = _pick_t_tile(D, itemsize)
    grid = (pl.cdiv(T, t_tile),)

    grid_spec = pltpu.PrefetchScalarGridSpec(
        num_scalar_prefetch=0,
        grid=grid,
        in_specs=[
            # proj: resident across the whole grid (constant block index).
            pl.BlockSpec((1, D), lambda i: (0, 0)),
            # tok_emb: streamed tile-by-tile; last dim = full D (no pad copy),
            # last (possibly partial) tile handled by Pallas masking.
            pl.BlockSpec((t_tile, D), lambda i: (i, 0)),
        ],
        # Lane-dense (1, t_tile) output blocks; out-of-range lanes of the last
        # block are masked on store, so no padded scores reach top_k.
        out_specs=pl.BlockSpec((1, t_tile), lambda i: (0, i)),
    )

    scores = pl.pallas_call(
        _score_kernel,
        out_shape=jax.ShapeDtypeStruct((1, T), jnp.float32),
        grid_spec=grid_spec,
        compiler_params=pltpu.CompilerParams(
            dimension_semantics=("parallel",)),
    )(proj, tok_emb)

    return scores[0]


def text_selection_forward(cap_emb_norm, weight, bias, selection_ratio):
    """'ratio' strategy of TextSelection.forward.

    cap_emb_norm: (L, D) = [CLS; tokens].  Returns (k + 1, D) where
    k = ceil((L-1) * selection_ratio): selected tokens (original order, as with
    PyTorch boolean-mask indexing) followed by the CLS row.
    """
    cls_emb = cap_emb_norm[0:1, :]
    tok_emb = cap_emb_norm[1:, :]
    T = tok_emb.shape[0]

    scores = attn_scores_pallas(cls_emb, tok_emb, weight, bias)

    num_keep = math.ceil(T * selection_ratio)
    # Note: jax.lax.top_k tie-breaking may differ from torch.topk for exactly
    # equal scores; the kept *set* semantics are otherwise identical.
    _, keep_idx = jax.lax.top_k(scores, num_keep)
    keep_idx = jnp.sort(keep_idx)  # boolean-mask indexing preserves original order
    tok_sel = jnp.take(tok_emb, keep_idx, axis=0)
    return jnp.concatenate([tok_sel, cls_emb], axis=0)


# ----------------------------- references ------------------------------------

def _reference_scores(cls_emb, tok_emb, weight, bias):
    proj = cls_emb @ weight.T + bias
    return jnp.sum(proj * tok_emb, axis=-1)


def _reference_forward(cap_emb_norm, weight, bias, selection_ratio):
    """Plain-JAX reference mirroring the PyTorch module (ratio strategy)."""
    cls_emb = cap_emb_norm[0:1, :]
    tok_emb = cap_emb_norm[1:, :]
    scores = _reference_scores(cls_emb, tok_emb, weight, bias)
    num_keep = math.ceil(tok_emb.shape[0] * selection_ratio)
    _, keep_idx = jax.lax.top_k(scores, num_keep)
    keep_idx = jnp.sort(keep_idx)
    tok_sel = jnp.take(tok_emb, keep_idx, axis=0)
    return jnp.concatenate([tok_sel, cls_emb], axis=0)


if __name__ == "__main__":
    key = jax.random.PRNGKey(0)

    def make_inputs(L, D, k):
        k_x, k_w, k_b = jax.random.split(k, 3)
        cap_emb = jax.random.normal(k_x, (L, D), dtype=jnp.float32)
        cap_emb_norm = cap_emb / jnp.linalg.norm(cap_emb, axis=-1, keepdims=True)
        bound = 1.0 / math.sqrt(D)
        weight = jax.random.uniform(k_w, (D, D), minval=-bound, maxval=bound,
                                    dtype=jnp.float32)
        bias = jax.random.uniform(k_b, (D,), minval=-bound, maxval=bound,
                                  dtype=jnp.float32)
        return cap_emb_norm, weight, bias

    k_small, k_large = jax.random.split(key)

    # --- Case 1: tiny caption (module-scale shapes) -> small-shape fallback. ---
    L, D, ratio = 9, 32, 0.5
    cap, W, b = make_inputs(L, D, k_small)
    out = jax.block_until_ready(text_selection_forward(cap, W, b, ratio))
    ref = _reference_forward(cap, W, b, ratio)
    assert out.shape == (math.ceil((L - 1) * ratio) + 1, D), out.shape
    assert jnp.allclose(out, ref, atol=1e-5, rtol=1e-5), "small-case mismatch"

    # --- Case 2: long caption -> Pallas streaming-GEMV path (multi-tile grid,
    # masked partial last tile). ---
    L, D, ratio = 1501, 512, 0.3
    cap, W, b = make_inputs(L, D, k_large)
    cls_emb, tok_emb = cap[0:1, :], cap[1:, :]
    T = tok_emb.shape[0]

    scores_k = jax.block_until_ready(attn_scores_pallas(cls_emb, tok_emb, W, b))
    scores_r = _reference_scores(cls_emb, tok_emb, W, b)
    assert scores_k.shape == (T,), scores_k.shape
    assert jnp.allclose(scores_k, scores_r, atol=1e-4, rtol=1e-4), "score mismatch"

    out = jax.block_until_ready(text_selection_forward(cap, W, b, ratio))
    num_keep = math.ceil(T * ratio)
    assert out.shape == (num_keep + 1, D), out.shape

    # Tie-robust end-to-end checks (avoid flakiness from near-equal scores):
    # (a) output rows == kernel-selected tokens in original order + CLS last.
    _, keep_idx = jax.lax.top_k(scores_k, num_keep)
    keep_idx = jnp.sort(keep_idx)
    expected = jnp.concatenate([jnp.take(tok_emb, keep_idx, axis=0), cls_emb], axis=0)
    assert jnp.allclose(out, expected, atol=1e-6), "selection/gather plumbing mismatch"
    # (b) the selected set is a valid top-k of the reference scores (up to tol).
    kth_ref = jnp.sort(scores_r)[T - num_keep]
    assert bool(jnp.all(scores_r[keep_idx] >= kth_ref - 1e-3)), "not a top-k set"

    print("KERNEL_OK")
</pallas_src>

<mosaic_0001>
module attributes {stable_mosaic.version = 11 : i64} {
  func.func @_score_kernel(%arg0: i32, %arg1: memref<1x512xf32, #tpu.memory_space<vmem>>, %arg2: memref<1024x512xf32, #tpu.memory_space<vmem>>, %arg3: memref<1x1024xf32, #tpu.memory_space<vmem>>) attributes {dimension_semantics = [#tpu.dimension_semantics<parallel>], iteration_bounds = array<i64: 2>, scalar_prefetch = 0 : i64, scratch_operands = 0 : i64, tpu.core_type = #tpu.core_type<tc>, window_params = [{pipeline_mode = #tpu.pipeline_mode<synchronous>, transform_indices = @transform_0, window_bounds = array<i64: 1, 512>}, {transform_indices = @transform_1, window_bounds = array<i64: 1024, 512>}, {transform_indices = @transform_2, window_bounds = array<i64: 1, 1024>}]} {
    %c0 = arith.constant 0 : index
    %c0_0 = arith.constant 0 : index
    %0 = vector.load %arg2[%c0, %c0_0] : memref<1024x512xf32, #tpu.memory_space<vmem>>, vector<1024x512xf32>
    %c0_1 = arith.constant 0 : index
    %c0_2 = arith.constant 0 : index
    %1 = vector.load %arg1[%c0_1, %c0_2] : memref<1x512xf32, #tpu.memory_space<vmem>>, vector<1x512xf32>
    %cst = arith.constant dense<0.000000e+00> : vector<1x1024xf32>
    %2 = tpu.matmul %1, %0, %cst {dimension_numbers = #tpu.dot_dimension_numbers<[1], [1], [0], [0], [0, 0, 1, 0], [], []>} : vector<1x512xf32>, vector<1024x512xf32>, vector<1x1024xf32> -> vector<1x1024xf32>
    %c0_3 = arith.constant 0 : index
    %c0_4 = arith.constant 0 : index
    %3 = vector.load %arg3[%c0_3, %c0_4] : memref<1x1024xf32, #tpu.memory_space<vmem>>, vector<1x1024xf32>
    tpu.vector_store %arg3[%c0_3, %c0_4], %2 {strides = array<i32>} : memref<1x1024xf32, #tpu.memory_space<vmem>>, vector<1x1024xf32>,
    return
  }
  func.func @transform_0(%arg0: i32) -> (i32, i32) {
    %c0_i32 = arith.constant 0 : i32
    %c0_i32_0 = arith.constant 0 : i32
    %c0_i32_1 = arith.constant 0 : i32
    return %c0_i32, %c0_i32_0 : i32, i32
  }
  func.func @transform_1(%arg0: i32) -> (i32, i32) {
    %c0_i32 = arith.constant 0 : i32
    %c0_i32_0 = arith.constant 0 : i32
    return %arg0, %c0_i32 : i32, i32
  }
  func.func @transform_2(%arg0: i32) -> (i32, i32) {
    %c0_i32 = arith.constant 0 : i32
    %c0_i32_0 = arith.constant 0 : i32
    return %c0_i32, %arg0 : i32, i32
  }
}

</mosaic_0001>

<bundles_post_ra>
// kernel: tpu_custom_call.1
= control target key start
LH: loop header
LB: loop body
LE: loop exit
PB: predicated region body
PF: predicated region fallthrough
CT: control target
= control target key end

     0   :  { %7 = vsyncpa [#allocation3], 0  ;;  %s2982_s0 = inlined_call_operand.hbm [shape: f32[1,512], index: 0, kind: input, shape index: {}]   ;;  %s2983_s1 = inlined_call_operand.hbm [shape: f32[1500,512], index: 1, kind: input, shape index: {}]   ;;  %s2984_s2 = inlined_call_operand.hbm [shape: f32[1,1500], index: 2, kind: output, shape index: {}]  }
   0x1   :  { %8 = vsyncpa [#allocation6], 0 }
   0x2   :  { %10 = vsyncpa [#allocation6 + $0x1], 0 }
   0x3   :  { %11 = vsyncpa [#allocation4], 0 }
   0x4   :  { %13 = vsyncpa [#allocation4 + $0x1], 0  ;;  %s2207_s9 = smov 0   ;;  %s2209_s10 = smov 0  }
   0x5   :  { %s2211_s11 = smov 0   ;;  %s2213_s12 = smov 0  }
   0x6 LB: > { %s2228_s13 = sadd.s32 4294967295, %s2184_s12   ;;  %s1457_s14 = sadd.s32 4294967294, %s2184_s12   ;;  %s2184_s12 = sphi %s2213_s12, %s3004_s12   ;;  %s2180_s11 = sphi %s2211_s11, %s3003_s11   ;;  %s2176_s10 = sphi %s2209_s10, %s3002_s10   ;;  %s2172_s9 = sphi %s2207_s9, %s3001_s9  }
   0x7   : > { %s2232_s15 = sadd.s32 1, %s2184_s12   ;;  %s47_s16 = sadd.s32 1, %s2180_s11 }
   0x8   : > { %s44_s17 = ssub.s32 %s2184_s12, %s2232_s15  ;;  %p54_p0 = scmp.ne.s32.totalorder %s2180_s11, %s2176_s10 }
   0x9   : > { %p45_p1 = scmp.eq.s32.totalorder %s44_s17, 0  ;;  %p55_p2 = scmp.eq.s32.totalorder %s2184_s12, 0 }
   0xa   : > { %p60_p3 = scmp.ne.s32.totalorder %s2176_s10, %s2172_s9  ;;  %p2985_p4 = scmp.eq.s32.totalorder %s2228_s13, 0 }
   0xb   : > { %s2244_s18 = scalar_select %p45_p1, %s2180_s11, %s47_s16  }
   0xc   : > { %p2246_p5 = por %p55_p2, %p54_p0  ;;  %p2252_p6 = por %p2985_p4, %p60_p3 }
   0xd   : > { %p84_p7 = scmp.eq.s32.totalorder %s2228_s13, 1  ;;  %p90_p8 = scmp.eq.s32.totalorder %s1457_s14, 1 }
   0xe   : > { %s2988_s19 = scalar_select %p2246_p5, 1, 0 }
   0xf   : > { %s2989_s20 = scalar_select %p2252_p6, 1, 0 }
  0x10   : > { %p1458_p9 = scmp.ge.s32.totalorder %s2184_s12, 1  ;;  %p97_p10 = scmp.lt.s32.totalorder %s2184_s12, 3 }
  0x11   : > { %p2259_p11 = por %p84_p7, %p54_p0  ;;  %p2263_p12 = por %p90_p8, %p60_p3 }
  0x12   : > { %p2267_p13 = pnand %p1458_p9, %p97_p10  ;;  %s2186_s24 = smov [#allocation2]  }
  0x13   : > { %s2990_s21 = scalar_select %p2259_p11, 1, 0 }
  0x14   : > { %s2991_s22 = scalar_select %p2263_p12, 1, 0 }
  0x15   : > { %s2992_s23 = scalar_select %p2267_p13, 1, 0 }
  0x16   : > { %p2011_p1 = pneg %p2267_p13  ;;  %s110_s25 = sshll.u32 %s2186_s24, 4  ;;  %s111_s25 = int_to_ptr.vmem [resolvable:$true] %s110_s25 }
  0x17   : > { %s2058_s29 = scalar_lea.hbm %s2982_s0, 64 }
  0x18   : > { %p2275_p2 = pnand %p2011_p1, %p2985_p4  ;;  %p2059_p0 = scmp.ne.s32.totalorder %s2982_s0, %s2058_s29 }
  0x19   : > { %p2065_p9 = scmp.lt.u32.totalorder %s2058_s29, %s2982_s0 }
  0x1a   : > { %p2060_p3 = pneg %p2275_p2 }
  0x1c   : > { %p2061_p7 = pnand %p2060_p3, %p2059_p0 }
  0x1e   : > { %p2062_p8 = pneg %p2061_p7 }
  0x20   : > { %p2067_p10 = pnand %p2065_p9, %p2062_p8 }
  0x22   : > { %2070 = shalt.err (!%p2067_p10)
}
  0x23   : > { %s2071_s6 = scalar_lea.vmem %s111_s25, 64  ;;  %p2079_p11 = scmp.lt.s32.totalorder %s111_s25, %s111_s25 }
  0x24   : > { %p2072_p1 = scmp.ne.s32.totalorder %s111_s25, %s2071_s6  ;;  %p2080_p6 = scmp.lt.s32.totalorder %s2071_s6, %s2071_s6 }
  0x26   : > { %p2074_p4 = pnand %p2072_p1, %p2060_p3  ;;  %p2081_p13 = por %p2080_p6, %p2079_p11 }
  0x28   : > { %p2075_p12 = pneg %p2074_p4 }
  0x2a   : > { %p2082_p5 = pnand %p2081_p13, %p2075_p12 }
  0x2c   : > { %2085 = shalt.err (!%p2082_p5)
}
  0x2d   : > { %2014 = dma.hbm_to_vmem [thread:$0]  (!%p2275_p2), %s2982_s0, 64, %s111_s25, [#allocation3]  }
  0x2e   : > { %p1460_p0 = scmp.ge.s32.totalorder %s2184_s12, 2 }
  0x2f   : > { %p2994_p7 = scmp.ne.s32.totalorder (!%p1460_p0), %s2988_s19, 0 }
  0x30   : > { %117 = sbr.rel (%p1460_p0) target bundleno = 90 (0x5a), region = 20 }
  0x37   : > { %120 = sbr.rel (!%p2994_p7) target bundleno = 90 (0x5a), region = 24  ;;  %s121_s14 = sand.u32 (%p2994_p7), 1, %s2180_s11  }
  0x38   : > { %s1462_s16 = sshll.u32 (%p2994_p7), %s2184_s12, 7  ;;  %s1461_s17 = sshll.u32 (%p2994_p7), %s121_s14, 12 }
  0x39   : > { %s127_s24 = ssub.s32 (%p2994_p7), 188, %s1462_s16  ;;  %s2305_s27 = scalar_lea.sflag (%p2994_p7), [#allocation6], %s121_s14 }
  0x3a   : > { %p128_p4 = scmp.lt.s32.totalorder (%p2994_p7), %s127_s24, 128  ;;  %s125_s28 = scalar_lea.vmem (%p2994_p7), [#allocation5], %s1461_s17 }
  0x3e   : > { %s3006_s24 = smov (!%p128_p4, %s127_s24), 128 }
  0x3f   : > { %s2302_s26 = sshll.u32 %s3006_s24, 9 }
  0x40   : > { %s133_s25 = ssub.s32 65536, %s2302_s26 }
  0x41   : > { %134 = vsyncadd %s2305_s27, %s133_s25  ;;  %p1465_p5 = scmp.ne.s32.totalorder %s2302_s26, 0  ;;  %s1483_s19 = sshll.u32 %s2184_s12, 16 }
  0x42   : > { %s2313_s3 = scalar_lea.hbm %s2983_s1, %s1483_s19  ;;  %s140_s4 = sshll.u32 %s125_s28, 4  ;;  %s2315_s4 = int_to_ptr.vmem [resolvable:$true] %s140_s4 }
  0x43   : > { %s2086_s5 = scalar_lea.hbm %s2313_s3, %s2302_s26  ;;  %s2090_s8 = scalar_lea.hbm %s2983_s1, 96256 }
  0x44   : > { %p2087_p6 = scmp.ne.s32.totalorder %s2313_s3, %s2086_s5  ;;  %p2091_p13 = scmp.lt.u32.totalorder %s2313_s3, %s2983_s1 }
  0x45   : > { %p2092_p2 = scmp.lt.u32.totalorder %s2090_s8, %s2086_s5  ;;  %p2094_p8 = scmp.lt.u32.totalorder %s2086_s5, %s2313_s3 }
  0x46   : > { %p2088_p11 = pnand %p2087_p6, %p1465_p5 }
  0x47   : > { %p2093_p3 = por %p2092_p2, %p2091_p13 }
  0x48   : > { %p2089_p12 = pneg %p2088_p11 }
  0x49   : > { %p2095_p9 = por %p2094_p8, %p2093_p3 }
  0x4b   : > { %p2096_p10 = pnand %p2095_p9, %p2089_p12 }
  0x4d   : > { %2099 = shalt.err (!%p2096_p10)
}
  0x4e   : > { %s2100_s17 = scalar_lea.vmem %s2315_s4, %s2302_s26  ;;  %s2187_s24 = smov [#allocation5]  }
  0x4f   : > { %p2101_p1 = scmp.ne.s32.totalorder %s2315_s4, %s2100_s17  ;;  %s2104_s25 = sshll.u32 %s2187_s24, 4  ;;  %s2105_s25 = int_to_ptr.vmem [resolvable:$false] %s2104_s25 }
  0x50   : > { %s2106_s28 = scalar_lea.vmem %s2105_s25, 131072  ;;  %p2107_p6 = scmp.lt.s32.totalorder %s2315_s4, %s2105_s25 }
  0x51   : > { %p2102_p7 = pnand %p2101_p1, %p1465_p5  ;;  %p2108_p11 = scmp.lt.s32.totalorder %s2106_s28, %s2100_s17 }
  0x53   : > { %p2103_p4 = pneg %p2102_p7  ;;  %p2109_p13 = por %p2108_p11, %p2107_p6 }
  0x55   : > { %p2110_p2 = pnand %p2109_p13, %p2103_p4 }
  0x57   : > { %2113 = shalt.err (!%p2110_p2)
}
  0x58   : > { %s2188_s19 = smov 512   ;;  %s2189_s29 = smov 32  }
  0x59   : > { %146 = dma.hbm_to_vmem [thread:$0]  (%p1465_p5), %s2313_s3, %s2302_s26, %s2315_s4, %s2305_s27, %s2188_s19, %s2188_s19, %s2189_s29  }
  0x5a PF: > { %p2995_p12 = scmp.ne.s32.totalorder %s2992_s23, 0 }
  0x5b   : > { %p2996_p3 = scmp.eq.s32.totalorder (!%p2995_p12), %s2228_s13, 0 }
  0x5c   : > { %152 = sbr.rel (%p2995_p12) target bundleno = 873 (0x369), region = 28 }
  0x63   : > { %2159 = dma.done.wait (%p2996_p3), [#allocation3], 64   ;;  %p2997_p8 = pmov %p2996_p3 }
  0x64   : > { %s2349_s30 = sand.u32 1, %s2176_s10   ;;  %p2998_p5 = scmp.ne.s32.totalorder %s2989_s20, 0 }
  0x65   : > { %2161 = vsyncadd (%p2997_p8), [#allocation3], 4294967232  ;;  %s1472_s5 = sshll.u32 %s2349_s30, 12  ;;  %s159_s6 = scalar_lea.sflag [#allocation6], %s2349_s30 }
  0x66   : > { %s2353_s26 = scalar_lea.vmem [#allocation5], %s1472_s5 }
  0x67   : > { %2163 = dma.done.wait (%p2998_p5), %s159_s6, 65536  }
  0x68   : > { %2165 = vsyncadd (%p2998_p5), %s159_s6, 4294901760  ;;  %v195_v0 = vld [vmem:[%s2353_s26 + $0x8] sm:$0xff]  ;;  %v194_v5 = vld [vmem:[%s2353_s26] sm:$0xff]  ;;  %v708_v62 = vlaneseq  ;;  %s1473_s20 = sshll.u32 %s2349_s30, 3  ;;  %s1356_s27 = scalar_lea.sflag [#allocation4], %s2349_s30 }
  0x69   : > { %v199_v1 = vld [vmem:[%s2353_s26 + $0x28] sm:$0xff]  ;;  %v198_v6 = vld [vmem:[%s2353_s26 + $0x20] sm:$0xff]  ;;  %s182_s23 = scalar_lea.vmem [#allocation7], %s1473_s20  ;;  %p2999_p9 = scmp.ne.s32.totalorder %s2990_s21, 0 }
  0x6a   : > { %v323_v2 = vld [vmem:[%s2353_s26 + $0x408] sm:$0xff]  ;;  %v1485_v3 = vpack.c.bf16 %v199_v1, %v195_v0  ;;  %v1487_v8 = vpack.c.bf16 %v198_v6, %v194_v5  ;;  %v322_v9 = vld [vmem:[%s2353_s26 + $0x400] sm:$0xff]  ;;  %s1475_s3 = sshll.u32 (%p2999_p9), %s2228_s13, 3 }
  0x6b   : > { %v327_v4 = vld [vmem:[%s2353_s26 + $0x428] sm:$0xff]  ;;  %v326_v10 = vld [vmem:[%s2353_s26 + $0x420] sm:$0xff]  ;;  %s1364_s4 = ssub.s32 (%p2999_p9), 12, %s1475_s3 }
  0x6c   : > { %v1613_v7 = vpack.c.bf16 %v327_v4, %v323_v2  ;;  %v203_v11 = vld [vmem:[%s2353_s26 + $0x48] sm:$0xff]  ;;  %1486 = vmatprep.subr.bf16.mxu0 %v1485_v3  ;;  %v1615_v12 = vpack.c.bf16 %v326_v10, %v322_v9  ;;  %v202_v18 = vld [vmem:[%s2353_s26 + $0x40] sm:$0xff]  ;;  %v2403_v3 = vshrl.u32 %v708_v62, 7  ;;  %p1365_p10 = scmp.lt.s32.totalorder (%p2999_p9), %s1364_s4, 8 }
  0x6d   : > { %v207_v13 = vld [vmem:[%s2353_s26 + $0x68] sm:$0xff]  ;;  %1488 = vmatpush1.bf16.xpose.msra.mxu0 %v1487_v8  ;;  %v206_v19 = vld [vmem:[%s2353_s26 + $0x60] sm:$0xff] }
  0x6e   : > { %v331_v14 = vld [vmem:[%s2353_s26 + $0x448] sm:$0xff]  ;;  %1614 = vmatprep.subr.bf16.mxu1 %v1613_v7  ;;  %v1489_v16 = vpack.c.bf16 %v207_v13, %v203_v11  ;;  %v330_v20 = vld [vmem:[%s2353_s26 + $0x440] sm:$0xff]  ;;  %v1491_v26 = vpack.c.bf16 %v206_v19, %v202_v18 }
  0x6f   : > { %v335_v15 = vld [vmem:[%s2353_s26 + $0x468] sm:$0xff]  ;;  %1616 = vmatpush1.bf16.xpose.msra.mxu1 %v1615_v12  ;;  %v334_v21 = vld [vmem:[%s2353_s26 + $0x460] sm:$0xff]  ;;  %v714_v12 = vsub.s32 1, %v2403_v3 }
  0x70   : > { %v1617_v17 = vpack.c.bf16 %v335_v15, %v331_v14  ;;  %1490 = vmatprep.subr.bf16.mxu0 %v1489_v16  ;;  %v211_v22 = vld [vmem:[%s2353_s26 + $0x88] sm:$0xff]  ;;  %v1619_v27 = vpack.c.bf16 %v334_v21, %v330_v20  ;;  %v210_v30 = vld [vmem:[%s2353_s26 + $0x80] sm:$0xff] }
  0x71   : > { %v215_v23 = vld [vmem:[%s2353_s26 + $0xa8] sm:$0xff]  ;;  %v214_v31 = vld [vmem:[%s2353_s26 + $0xa0] sm:$0xff] }
  0x72   : > { %1618 = vmatprep.subr.bf16.mxu1 %v1617_v17  ;;  %v339_v24 = vld [vmem:[%s2353_s26 + $0x488] sm:$0xff]  ;;  %v1493_v28 = vpack.c.bf16 %v215_v23, %v211_v22  ;;  %v338_v32 = vld [vmem:[%s2353_s26 + $0x480] sm:$0xff]  ;;  %v1495_v38 = vpack.c.bf16 %v214_v31, %v210_v30  ;;  %v2414_v17 = vld [vmem:[#allocation2] sm:$0xf] }
  0x73   : > { %v343_v25 = vld [vmem:[%s2353_s26 + $0x4a8] sm:$0xff]  ;;  %v342_v33 = vld [vmem:[%s2353_s26 + $0x4a0] sm:$0xff]  ;;  %v2417_v18 = vrot.slane %v2414_v17, %v714_v12 }
  0x74   : > { %v1621_v29 = vpack.c.bf16 %v343_v25, %v339_v24  ;;  %v219_v34 = vld [vmem:[%s2353_s26 + $0xc8] sm:$0xff]  ;;  %v1623_v39 = vpack.c.bf16 %v342_v33, %v338_v32  ;;  %v218_v42 = vld [vmem:[%s2353_s26 + $0xc0] sm:$0xff] }
  0x75   : > { %1492 = vmatpush1.bf16.xpose.msra.mxu0 %v1491_v26  ;;  %v223_v35 = vld [vmem:[%s2353_s26 + $0xe8] sm:$0xff]  ;;  %v222_v43 = vld [vmem:[%s2353_s26 + $0xe0] sm:$0xff]  ;;  %792 = vmatprep.mubr.f32.mxu0 %v2417_v18 }
  0x76   : > { %1494 = vmatprep.subr.bf16.mxu0 %v1493_v28  ;;  %v347_v36 = vld [vmem:[%s2353_s26 + $0x4c8] sm:$0xff]  ;;  %v1497_v40 = vpack.c.bf16 %v223_v35, %v219_v34  ;;  %v346_v44 = vld [vmem:[%s2353_s26 + $0x4c0] sm:$0xff]  ;;  %v1499_v50 = vpack.c.bf16 %v222_v43, %v218_v42  ;;  %934 = vmatprep.mubr.f32.mxu1 %v2417_v18 }
  0x77   : > { %1620 = vmatpush1.bf16.xpose.msra.mxu1 %v1619_v27  ;;  %v351_v37 = vld [vmem:[%s2353_s26 + $0x4e8] sm:$0xff]  ;;  %v350_v45 = vld [vmem:[%s2353_s26 + $0x4e0] sm:$0xff] }
  0x78   : > { %1622 = vmatprep.subr.bf16.mxu1 %v1621_v29  ;;  %v1625_v41 = vpack.c.bf16 %v351_v37, %v347_v36  ;;  %v227_v46 = vld [vmem:[%s2353_s26 + $0x108] sm:$0xff]  ;;  %v1627_v51 = vpack.c.bf16 %v350_v45, %v346_v44  ;;  %v226_v54 = vld [vmem:[%s2353_s26 + $0x100] sm:$0xff] }
  0x79   : > { %v231_v47 = vld [vmem:[%s2353_s26 + $0x128] sm:$0xff]  ;;  %v230_v55 = vld [vmem:[%s2353_s26 + $0x120] sm:$0xff] }
  0x7a   : > { %v355_v48 = vld [vmem:[%s2353_s26 + $0x508] sm:$0xff]  ;;  %v1501_v52 = vpack.c.bf16 %v231_v47, %v227_v46  ;;  %v354_v56 = vld [vmem:[%s2353_s26 + $0x500] sm:$0xff]  ;;  %v1503_v63 = vpack.c.bf16 %v230_v55, %v226_v54 }
  0x7b   : > { %v359_v49 = vld [vmem:[%s2353_s26 + $0x528] sm:$0xff]  ;;  %v358_v57 = vld [vmem:[%s2353_s26 + $0x520] sm:$0xff] }
  0x7c   : > { %v1629_v53 = vpack.c.bf16 %v359_v49, %v355_v48  ;;  %v235_v58 = vld [vmem:[%s2353_s26 + $0x148] sm:$0xff]  ;;  %v1631_v0 = vpack.c.bf16 %v358_v57, %v354_v56  ;;  %v234_v4 = vld [vmem:[%s2353_s26 + $0x140] sm:$0xff] }
  0x7d   : > { %1496 = vmatpush1.bf16.xpose.msra.mxu0 %v1495_v38  ;;  %v239_v59 = vld [vmem:[%s2353_s26 + $0x168] sm:$0xff]  ;;  %v238_v5 = vld [vmem:[%s2353_s26 + $0x160] sm:$0xff] }
  0x7e   : > { %1498 = vmatprep.subr.bf16.mxu0 %v1497_v40  ;;  %v363_v60 = vld [vmem:[%s2353_s26 + $0x548] sm:$0xff]  ;;  %v1505_v1 = vpack.c.bf16 %v239_v59, %v235_v58  ;;  %v362_v6 = vld [vmem:[%s2353_s26 + $0x540] sm:$0xff]  ;;  %v1507_v13 = vpack.c.bf16 %v238_v5, %v234_v4 }
  0x7f   : > { %1624 = vmatpush1.bf16.xpose.msra.mxu1 %v1623_v39  ;;  %v367_v61 = vld [vmem:[%s2353_s26 + $0x568] sm:$0xff]  ;;  %v366_v7 = vld [vmem:[%s2353_s26 + $0x560] sm:$0xff] }
  0x80   : > { %1626 = vmatprep.subr.bf16.mxu1 %v1625_v41  ;;  %v1633_v2 = vpack.c.bf16 %v367_v61, %v363_v60  ;;  %v243_v8 = vld [vmem:[%s2353_s26 + $0x188] sm:$0xff]  ;;  %v1635_v14 = vpack.c.bf16 %v366_v7, %v362_v6  ;;  %v242_v19 = vld [vmem:[%s2353_s26 + $0x180] sm:$0xff] }
  0x81   : > { %v247_v9 = vld [vmem:[%s2353_s26 + $0x1a8] sm:$0xff]  ;;  %v246_v20 = vld [vmem:[%s2353_s26 + $0x1a0] sm:$0xff] }
  0x82   : > { %v371_v10 = vld [vmem:[%s2353_s26 + $0x588] sm:$0xff]  ;;  %v1509_v15 = vpack.c.bf16 %v247_v9, %v243_v8  ;;  %v370_v21 = vld [vmem:[%s2353_s26 + $0x580] sm:$0xff]  ;;  %v1511_v27 = vpack.c.bf16 %v246_v20, %v242_v19 }
  0x83   : > { %v375_v11 = vld [vmem:[%s2353_s26 + $0x5a8] sm:$0xff]  ;;  %v374_v22 = vld [vmem:[%s2353_s26 + $0x5a0] sm:$0xff] }
  0x84   : > { %v1637_v16 = vpack.c.bf16 %v375_v11, %v371_v10  ;;  %v251_v23 = vld [vmem:[%s2353_s26 + $0x1c8] sm:$0xff]  ;;  %v1639_v28 = vpack.c.bf16 %v374_v22, %v370_v21  ;;  %v250_v31 = vld [vmem:[%s2353_s26 + $0x1c0] sm:$0xff] }
  0x85   : > { %1500 = vmatpush1.bf16.xpose.msra.mxu0 %v1499_v50  ;;  %v255_v24 = vld [vmem:[%s2353_s26 + $0x1e8] sm:$0xff]  ;;  %v254_v32 = vld [vmem:[%s2353_s26 + $0x1e0] sm:$0xff] }
  0x86   : > { %1502 = vmatprep.subr.bf16.mxu0 %v1501_v52  ;;  %v379_v25 = vld [vmem:[%s2353_s26 + $0x5c8] sm:$0xff]  ;;  %v1513_v29 = vpack.c.bf16 %v255_v24, %v251_v23  ;;  %v378_v33 = vld [vmem:[%s2353_s26 + $0x5c0] sm:$0xff]  ;;  %v1515_v39 = vpack.c.bf16 %v254_v32, %v250_v31 }
  0x87   : > { %1628 = vmatpush1.bf16.xpose.msra.mxu1 %v1627_v51  ;;  %v383_v26 = vld [vmem:[%s2353_s26 + $0x5e8] sm:$0xff]  ;;  %v382_v34 = vld [vmem:[%s2353_s26 + $0x5e0] sm:$0xff] }
  0x88   : > { %1630 = vmatprep.subr.bf16.mxu1 %v1629_v53  ;;  %v1641_v30 = vpack.c.bf16 %v383_v26, %v379_v25  ;;  %v259_v35 = vld [vmem:[%s2353_s26 + $0x208] sm:$0xff]  ;;  %v1643_v40 = vpack.c.bf16 %v382_v34, %v378_v33  ;;  %v258_v43 = vld [vmem:[%s2353_s26 + $0x200] sm:$0xff] }
  0x89   : > { %v263_v36 = vld [vmem:[%s2353_s26 + $0x228] sm:$0xff]  ;;  %v262_v44 = vld [vmem:[%s2353_s26 + $0x220] sm:$0xff] }
  0x8a   : > { %v387_v37 = vld [vmem:[%s2353_s26 + $0x608] sm:$0xff]  ;;  %v1517_v41 = vpack.c.bf16 %v263_v36, %v259_v35  ;;  %v386_v45 = vld [vmem:[%s2353_s26 + $0x600] sm:$0xff]  ;;  %v1519_v51 = vpack.c.bf16 %v262_v44, %v258_v43 }
  0x8b   : > { %v391_v38 = vld [vmem:[%s2353_s26 + $0x628] sm:$0xff]  ;;  %v390_v46 = vld [vmem:[%s2353_s26 + $0x620] sm:$0xff] }
  0x8c   : > { %v1645_v42 = vpack.c.bf16 %v391_v38, %v387_v37  ;;  %v267_v47 = vld [vmem:[%s2353_s26 + $0x248] sm:$0xff]  ;;  %v1647_v52 = vpack.c.bf16 %v390_v46, %v386_v45  ;;  %v266_v55 = vld [vmem:[%s2353_s26 + $0x240] sm:$0xff] }
  0x8d   : > { %1504 = vmatpush1.bf16.xpose.msra.mxu0 %v1503_v63  ;;  %v271_v48 = vld [vmem:[%s2353_s26 + $0x268] sm:$0xff]  ;;  %v270_v56 = vld [vmem:[%s2353_s26 + $0x260] sm:$0xff] }
  0x8e   : > { %1506 = vmatprep.subr.bf16.mxu0 %v1505_v1  ;;  %v395_v49 = vld [vmem:[%s2353_s26 + $0x648] sm:$0xff]  ;;  %v1521_v53 = vpack.c.bf16 %v271_v48, %v267_v47  ;;  %v394_v57 = vld [vmem:[%s2353_s26 + $0x640] sm:$0xff]  ;;  %v1523_v63 = vpack.c.bf16 %v270_v56, %v266_v55 }
  0x8f   : > { %1632 = vmatpush1.bf16.xpose.msra.mxu1 %v1631_v0  ;;  %v399_v50 = vld [vmem:[%s2353_s26 + $0x668] sm:$0xff]  ;;  %v398_v58 = vld [vmem:[%s2353_s26 + $0x660] sm:$0xff] }
  0x90   : > { %1634 = vmatprep.subr.bf16.mxu1 %v1633_v2  ;;  %v1649_v54 = vpack.c.bf16 %v399_v50, %v395_v49  ;;  %v275_v59 = vld [vmem:[%s2353_s26 + $0x288] sm:$0xff]  ;;  %v1651_v0 = vpack.c.bf16 %v398_v58, %v394_v57  ;;  %v274_v4 = vld [vmem:[%s2353_s26 + $0x280] sm:$0xff] }
  0x91   : > { %v279_v60 = vld [vmem:[%s2353_s26 + $0x2a8] sm:$0xff]  ;;  %v278_v5 = vld [vmem:[%s2353_s26 + $0x2a0] sm:$0xff] }
  0x92   : > { %v403_v61 = vld [vmem:[%s2353_s26 + $0x688] sm:$0xff]  ;;  %v1525_v1 = vpack.c.bf16 %v279_v60, %v275_v59  ;;  %v402_v6 = vld [vmem:[%s2353_s26 + $0x680] sm:$0xff]  ;;  %v1527_v12 = vpack.c.bf16 %v278_v5, %v274_v4 }
  0x93   : > { %v407_v62 = vld [vmem:[%s2353_s26 + $0x6a8] sm:$0xff]  ;;  %v406_v7 = vld [vmem:[%s2353_s26 + $0x6a0] sm:$0xff] }
  0x94   : > { %v1653_v2 = vpack.c.bf16 %v407_v62, %v403_v61  ;;  %v283_v8 = vld [vmem:[%s2353_s26 + $0x2c8] sm:$0xff]  ;;  %v286_v19 = vld [vmem:[%s2353_s26 + $0x2e0] sm:$0xff] }
  0x95   : > { %1508 = vmatpush1.bf16.xpose.msra.mxu0 %v1507_v13  ;;  %v287_v9 = vld [vmem:[%s2353_s26 + $0x2e8] sm:$0xff]  ;;  %v1655_v13 = vpack.c.bf16 %v406_v7, %v402_v6  ;;  %v410_v20 = vld [vmem:[%s2353_s26 + $0x6c0] sm:$0xff]  ;;  %v197_v7 = vld [vmem:[%s2353_s26 + $0x18] sm:$0xff] }
  0x96   : > { %1510 = vmatprep.subr.bf16.mxu0 %v1509_v15  ;;  %v411_v10 = vld [vmem:[%s2353_s26 + $0x6c8] sm:$0xff]  ;;  %v414_v21 = vld [vmem:[%s2353_s26 + $0x6e0] sm:$0xff] }
  0x97   : > { %1636 = vmatpush1.bf16.xpose.msra.mxu1 %v1635_v14  ;;  %v415_v11 = vld [vmem:[%s2353_s26 + $0x6e8] sm:$0xff]  ;;  %v1529_v14 = vpack.c.bf16 %v287_v9, %v283_v8  ;;  %v294_v31 = vld [vmem:[%s2353_s26 + $0x320] sm:$0xff]  ;;  %v201_v8 = vld [vmem:[%s2353_s26 + $0x38] sm:$0xff] }
  0x98   : > { %1638 = vmatprep.subr.bf16.mxu1 %v1637_v16  ;;  %v1657_v15 = vpack.c.bf16 %v415_v11, %v411_v10  ;;  %v282_v16 = vld [vmem:[%s2353_s26 + $0x2c0] sm:$0xff]  ;;  %v291_v22 = vld [vmem:[%s2353_s26 + $0x308] sm:$0xff]  ;;  %v325_v9 = vld [vmem:[%s2353_s26 + $0x418] sm:$0xff] }
  0x99   : > { %v295_v23 = vld [vmem:[%s2353_s26 + $0x328] sm:$0xff]  ;;  %v1531_v26 = vpack.c.bf16 %v286_v19, %v282_v16  ;;  %v418_v32 = vld [vmem:[%s2353_s26 + $0x700] sm:$0xff]  ;;  %v329_v10 = vld [vmem:[%s2353_s26 + $0x438] sm:$0xff] }
  0x9a   : > { %v419_v24 = vld [vmem:[%s2353_s26 + $0x708] sm:$0xff]  ;;  %v422_v33 = vld [vmem:[%s2353_s26 + $0x720] sm:$0xff]  ;;  %v196_v16 = vld [vmem:[%s2353_s26 + $0x10] sm:$0xff] }
  0x9b   : > { %v423_v25 = vld [vmem:[%s2353_s26 + $0x728] sm:$0xff]  ;;  %v302_v43 = vld [vmem:[%s2353_s26 + $0x360] sm:$0xff]  ;;  %v200_v19 = vld [vmem:[%s2353_s26 + $0x30] sm:$0xff] }
  0x9c   : > { %v299_v34 = vld [vmem:[%s2353_s26 + $0x348] sm:$0xff]  ;;  %v426_v44 = vld [vmem:[%s2353_s26 + $0x740] sm:$0xff] }
  0x9d   : > { %1512 = vmatpush1.bf16.xpose.msra.mxu0 %v1511_v27  ;;  %v1659_v27 = vpack.c.bf16 %v414_v21, %v410_v20  ;;  %v303_v35 = vld [vmem:[%s2353_s26 + $0x368] sm:$0xff]  ;;  %v430_v45 = vld [vmem:[%s2353_s26 + $0x760] sm:$0xff]  ;;  %v324_v20 = vld [vmem:[%s2353_s26 + $0x410] sm:$0xff] }
  0x9e   : > { %1514 = vmatprep.subr.bf16.mxu0 %v1513_v29  ;;  %v1661_v29 = vpack.c.bf16 %v423_v25, %v419_v24  ;;  %v427_v36 = vld [vmem:[%s2353_s26 + $0x748] sm:$0xff]  ;;  %v310_v55 = vld [vmem:[%s2353_s26 + $0x3a0] sm:$0xff]  ;;  %v328_v21 = vld [vmem:[%s2353_s26 + $0x430] sm:$0xff]  ;;  %v722_v24 = vsub.s32 3, %v2403_v3 }
  0x9f   : > { %1640 = vmatpush1.bf16.xpose.msra.mxu1 %v1639_v28  ;;  %v1533_v28 = vpack.c.bf16 %v295_v23, %v291_v22  ;;  %v431_v37 = vld [vmem:[%s2353_s26 + $0x768] sm:$0xff]  ;;  %v434_v56 = vld [vmem:[%s2353_s26 + $0x780] sm:$0xff]  ;;  %v205_v22 = vld [vmem:[%s2353_s26 + $0x58] sm:$0xff] }
  0xa0   : > { %1642 = vmatprep.subr.bf16.mxu1 %v1641_v30  ;;  %v290_v30 = vld [vmem:[%s2353_s26 + $0x300] sm:$0xff]  ;;  %v307_v46 = vld [vmem:[%s2353_s26 + $0x388] sm:$0xff]  ;;  %v209_v23 = vld [vmem:[%s2353_s26 + $0x78] sm:$0xff] }
  0xa1   : > { %v1535_v38 = vpack.c.bf16 %v294_v31, %v290_v30  ;;  %v311_v47 = vld [vmem:[%s2353_s26 + $0x3a8] sm:$0xff]  ;;  %v438_v57 = vld [vmem:[%s2353_s26 + $0x7a0] sm:$0xff]  ;;  %v1553_v30 = vpack.c.bf16 %v209_v23, %v205_v22  ;;  %v364_v22 = vld [vmem:[%s2353_s26 + $0x550] sm:$0xff] }
  0xa2   : > { %v435_v48 = vld [vmem:[%s2353_s26 + $0x788] sm:$0xff]  ;;  %v318_v4 = vld [vmem:[%s2353_s26 + $0x3e0] sm:$0xff]  ;;  %v368_v23 = vld [vmem:[%s2353_s26 + $0x570] sm:$0xff] }
  0xa3   : > { %v439_v49 = vld [vmem:[%s2353_s26 + $0x7a8] sm:$0xff]  ;;  %v442_v5 = vld [vmem:[%s2353_s26 + $0x7c0] sm:$0xff] }
  0xa4   : > { %v315_v58 = vld [vmem:[%s2353_s26 + $0x3c8] sm:$0xff]  ;;  %v446_v6 = vld [vmem:[%s2353_s26 + $0x7e0] sm:$0xff] }
  0xa5   : > { %1516 = vmatpush1.bf16.xpose.msra.mxu0 %v1515_v39  ;;  %v1663_v39 = vpack.c.bf16 %v422_v33, %v418_v32  ;;  %v319_v59 = vld [vmem:[%s2353_s26 + $0x3e8] sm:$0xff]  ;;  %v2515_v32 = vrot.slane %v2414_v17, %v722_v24  ;;  %v204_v33 = vld [vmem:[%s2353_s26 + $0x50] sm:$0xff]  ;;  %v245_v24 = vld [vmem:[%s2353_s26 + $0x198] sm:$0xff] }
  0xa6   : > { %1518 = vmatprep.subr.bf16.mxu0 %v1517_v41  ;;  %v1665_v41 = vpack.c.bf16 %v431_v37, %v427_v36  ;;  %v443_v60 = vld [vmem:[%s2353_s26 + $0x7c8] sm:$0xff]  ;;  %v336_v36 = vld [vmem:[%s2353_s26 + $0x470] sm:$0xff]  ;;  %v213_v37 = vld [vmem:[%s2353_s26 + $0x98] sm:$0xff] }
  0xa7   : > { %1644 = vmatpush1.bf16.xpose.msra.mxu1 %v1643_v40  ;;  %v1537_v40 = vpack.c.bf16 %v303_v35, %v299_v34  ;;  %v447_v61 = vld [vmem:[%s2353_s26 + $0x7e8] sm:$0xff]  ;;  %v208_v34 = vld [vmem:[%s2353_s26 + $0x70] sm:$0xff] }
  0xa8   : > { %1646 = vmatprep.subr.bf16.mxu1 %v1645_v42  ;;  %v298_v42 = vld [vmem:[%s2353_s26 + $0x340] sm:$0xff]  ;;  %v332_v35 = vld [vmem:[%s2353_s26 + $0x450] sm:$0xff] }
  0xa9   : > { %v1539_v50 = vpack.c.bf16 %v302_v43, %v298_v42  ;;  %v1683_v42 = vpack.c.bf16 %v336_v36, %v332_v35  ;;  %v248_v35 = vld [vmem:[%s2353_s26 + $0x1b0] sm:$0xff] }
  0xaa   : > { %v372_v36 = vld [vmem:[%s2353_s26 + $0x590] sm:$0xff] }
  0xad   : > { %1520 = vmatpush1.bf16.xpose.msra.mxu0 %v1519_v51  ;;  %v1667_v51 = vpack.c.bf16 %v430_v45, %v426_v44  ;;  %v212_v45 = vld [vmem:[%s2353_s26 + $0x90] sm:$0xff] }
  0xae   : > { %1522 = vmatprep.subr.bf16.mxu0 %v1521_v53  ;;  %v1669_v53 = vpack.c.bf16 %v439_v49, %v435_v48  ;;  %v344_v48 = vld [vmem:[%s2353_s26 + $0x4b0] sm:$0xff]  ;;  %v221_v49 = vld [vmem:[%s2353_s26 + $0xd8] sm:$0xff] }
  0xaf   : > { %1648 = vmatpush1.bf16.xpose.msra.mxu1 %v1647_v52  ;;  %v1541_v52 = vpack.c.bf16 %v311_v47, %v307_v46  ;;  %v216_v46 = vld [vmem:[%s2353_s26 + $0xb0] sm:$0xff] }
  0xb0   : > { %1650 = vmatprep.subr.bf16.mxu1 %v1649_v54  ;;  %v306_v54 = vld [vmem:[%s2353_s26 + $0x380] sm:$0xff]  ;;  %v340_v47 = vld [vmem:[%s2353_s26 + $0x490] sm:$0xff] }
  0xb1   : > { %v1543_v62 = vpack.c.bf16 %v310_v55, %v306_v54  ;;  %v1687_v54 = vpack.c.bf16 %v344_v48, %v340_v47  ;;  %v256_v47 = vld [vmem:[%s2353_s26 + $0x1f0] sm:$0xff] }
  0xb2   : > { %v380_v48 = vld [vmem:[%s2353_s26 + $0x5d0] sm:$0xff] }
  0xb5   : > { %1524 = vmatpush1.bf16.xpose.msra.mxu0 %v1523_v63  ;;  %v1671_v63 = vpack.c.bf16 %v438_v57, %v434_v56  ;;  %v220_v57 = vld [vmem:[%s2353_s26 + $0xd0] sm:$0xff] }
  0xb6   : > { %1526 = vmatprep.subr.bf16.mxu0 %v1525_v1  ;;  %v1673_v1 = vpack.c.bf16 %v447_v61, %v443_v60  ;;  %v352_v60 = vld [vmem:[%s2353_s26 + $0x4f0] sm:$0xff]  ;;  %v229_v61 = vld [vmem:[%s2353_s26 + $0x118] sm:$0xff] }
  0xb7   : > { %1652 = vmatpush1.bf16.xpose.msra.mxu1 %v1651_v0  ;;  %v1545_v0 = vpack.c.bf16 %v319_v59, %v315_v58  ;;  %v224_v58 = vld [vmem:[%s2353_s26 + $0xf0] sm:$0xff] }
  0xb8   : > { %1654 = vmatprep.subr.bf16.mxu1 %v1653_v2  ;;  %v314_v2 = vld [vmem:[%s2353_s26 + $0x3c0] sm:$0xff]  ;;  %v348_v59 = vld [vmem:[%s2353_s26 + $0x4d0] sm:$0xff] }
  0xb9   : > { %v1547_v11 = vpack.c.bf16 %v318_v4, %v314_v2  ;;  %v1691_v2 = vpack.c.bf16 %v352_v60, %v348_v59  ;;  %v264_v59 = vld [vmem:[%s2353_s26 + $0x230] sm:$0xff] }
  0xba   : > { %v388_v60 = vld [vmem:[%s2353_s26 + $0x610] sm:$0xff] }
  0xbd   : > { %1528 = vmatpush1.bf16.xpose.msra.mxu0 %v1527_v12  ;;  %v1675_v12 = vpack.c.bf16 %v446_v6, %v442_v5  ;;  %v228_v6 = vld [vmem:[%s2353_s26 + $0x110] sm:$0xff] }
  0xbe   : > { %1530 = vmatprep.subr.bf16.mxu0 %v1529_v14  ;;  %v1677_v14 = vpack.c.bf16 %v329_v10, %v325_v9  ;;  %v360_v9 = vld [vmem:[%s2353_s26 + $0x530] sm:$0xff]  ;;  %v237_v10 = vld [vmem:[%s2353_s26 + $0x158] sm:$0xff] }
  0xbf   : > { %1656 = vmatpush1.bf16.xpose.msra.mxu1 %v1655_v13  ;;  %v1549_v13 = vpack.c.bf16 %v201_v8, %v197_v7  ;;  %v232_v7 = vld [vmem:[%s2353_s26 + $0x130] sm:$0xff] }
  0xc0   : > { %1658 = vmatprep.subr.bf16.mxu1 %v1657_v15  ;;  %v710_v15 = vsub.s32 0, %v2403_v3  ;;  %v356_v8 = vld [vmem:[%s2353_s26 + $0x510] sm:$0xff] }
  0xc2   : > { %v2510_v25 = vrot.slane %v2414_v17, %v710_v15  ;;  %v1695_v15 = vpack.c.bf16 %v360_v9, %v356_v8  ;;  %v272_v8 = vld [vmem:[%s2353_s26 + $0x270] sm:$0xff] }
  0xc3   : > { %v396_v9 = vld [vmem:[%s2353_s26 + $0x650] sm:$0xff] }
  0xc5   : > { %1532 = vmatpush1.bf16.xpose.msra.mxu0 %v1531_v26  ;;  %v333_v26 = vld [vmem:[%s2353_s26 + $0x458] sm:$0xff] }
  0xc6   : > { %1534 = vmatprep.subr.bf16.mxu0 %v1533_v28  ;;  %v1551_v28 = vpack.c.bf16 %v200_v19, %v196_v16 }
  0xc7   : > { %1660 = vmatpush1.bf16.xpose.msra.mxu1 %v1659_v27  ;;  %v337_v27 = vld [vmem:[%s2353_s26 + $0x478] sm:$0xff] }
  0xc8   : > { %1662 = vmatprep.subr.bf16.mxu1 %v1661_v29  ;;  %v1679_v29 = vpack.c.bf16 %v328_v21, %v324_v20  ;;  %v1681_v31 = vpack.c.bf16 %v337_v27, %v333_v26  ;;  %v236_v20 = vld [vmem:[%s2353_s26 + $0x150] sm:$0xff]  ;;  %v249_v26 = vld [vmem:[%s2353_s26 + $0x1b8] sm:$0xff] }
  0xc9   : > { %v240_v21 = vld [vmem:[%s2353_s26 + $0x170] sm:$0xff]  ;;  %v373_v27 = vld [vmem:[%s2353_s26 + $0x598] sm:$0xff] }
  0xcd   : > { %1536 = vmatpush1.bf16.xpose.msra.mxu0 %v1535_v38  ;;  %v217_v38 = vld [vmem:[%s2353_s26 + $0xb8] sm:$0xff] }
  0xce   : > { %1538 = vmatprep.subr.bf16.mxu0 %v1537_v40  ;;  %v345_v40 = vld [vmem:[%s2353_s26 + $0x4b8] sm:$0xff]  ;;  %v1557_v43 = vpack.c.bf16 %v217_v38, %v213_v37  ;;  %v376_v37 = vld [vmem:[%s2353_s26 + $0x5b0] sm:$0xff] }
  0xcf   : > { %1664 = vmatpush1.bf16.xpose.msra.mxu1 %v1663_v39  ;;  %v341_v39 = vld [vmem:[%s2353_s26 + $0x498] sm:$0xff] }
  0xd0   : > { %1666 = vmatprep.subr.bf16.mxu1 %v1665_v41  ;;  %v1555_v41 = vpack.c.bf16 %v208_v34, %v204_v33  ;;  %v1685_v44 = vpack.c.bf16 %v345_v40, %v341_v39  ;;  %v244_v34 = vld [vmem:[%s2353_s26 + $0x190] sm:$0xff]  ;;  %v253_v38 = vld [vmem:[%s2353_s26 + $0x1d8] sm:$0xff] }
  0xd1   : > { %v257_v39 = vld [vmem:[%s2353_s26 + $0x1f8] sm:$0xff] }
  0xd2   : > { %v381_v40 = vld [vmem:[%s2353_s26 + $0x5d8] sm:$0xff] }
  0xd5   : > { %1540 = vmatpush1.bf16.xpose.msra.mxu0 %v1539_v50  ;;  %v225_v50 = vld [vmem:[%s2353_s26 + $0xf8] sm:$0xff] }
  0xd6   : > { %1542 = vmatprep.subr.bf16.mxu0 %v1541_v52  ;;  %v353_v52 = vld [vmem:[%s2353_s26 + $0x4f8] sm:$0xff]  ;;  %v1561_v55 = vpack.c.bf16 %v225_v50, %v221_v49  ;;  %v384_v49 = vld [vmem:[%s2353_s26 + $0x5f0] sm:$0xff] }
  0xd7   : > { %1668 = vmatpush1.bf16.xpose.msra.mxu1 %v1667_v51  ;;  %v349_v51 = vld [vmem:[%s2353_s26 + $0x4d8] sm:$0xff] }
  0xd8   : > { %1670 = vmatprep.subr.bf16.mxu1 %v1669_v53  ;;  %v1559_v53 = vpack.c.bf16 %v216_v46, %v212_v45  ;;  %v1689_v56 = vpack.c.bf16 %v353_v52, %v349_v51  ;;  %v252_v46 = vld [vmem:[%s2353_s26 + $0x1d0] sm:$0xff]  ;;  %v261_v50 = vld [vmem:[%s2353_s26 + $0x218] sm:$0xff] }
  0xd9   : > { %v265_v51 = vld [vmem:[%s2353_s26 + $0x238] sm:$0xff] }
  0xda   : > { %v389_v52 = vld [vmem:[%s2353_s26 + $0x618] sm:$0xff] }
  0xdd   : > { %1544 = vmatpush1.bf16.xpose.msra.mxu0 %v1543_v62  ;;  %v233_v62 = vld [vmem:[%s2353_s26 + $0x138] sm:$0xff] }
  0xde   : > { %1546 = vmatprep.subr.bf16.mxu0 %v1545_v0  ;;  %v361_v0 = vld [vmem:[%s2353_s26 + $0x538] sm:$0xff]  ;;  %v1565_v4 = vpack.c.bf16 %v233_v62, %v229_v61  ;;  %v392_v61 = vld [vmem:[%s2353_s26 + $0x630] sm:$0xff] }
  0xdf   : > { %1672 = vmatpush1.bf16.xpose.msra.mxu1 %v1671_v63  ;;  %v357_v63 = vld [vmem:[%s2353_s26 + $0x518] sm:$0xff] }
  0xe0   : > { %1674 = vmatprep.subr.bf16.mxu1 %v1673_v1  ;;  %v1563_v1 = vpack.c.bf16 %v224_v58, %v220_v57  ;;  %v1693_v5 = vpack.c.bf16 %v361_v0, %v357_v63  ;;  %v260_v58 = vld [vmem:[%s2353_s26 + $0x210] sm:$0xff]  ;;  %v269_v62 = vld [vmem:[%s2353_s26 + $0x258] sm:$0xff] }
  0xe1   : > { %v273_v63 = vld [vmem:[%s2353_s26 + $0x278] sm:$0xff] }
  0xe2   : > { %v397_v0 = vld [vmem:[%s2353_s26 + $0x658] sm:$0xff] }
  0xe5   : > { %1548 = vmatpush1.bf16.xpose.msra.mxu0 %v1547_v11  ;;  %v241_v11 = vld [vmem:[%s2353_s26 + $0x178] sm:$0xff] }
  0xe6   : > { %1550 = vmatprep.subr.bf16.mxu0 %v1549_v13  ;;  %v369_v13 = vld [vmem:[%s2353_s26 + $0x578] sm:$0xff]  ;;  %v1569_v16 = vpack.c.bf16 %v241_v11, %v237_v10  ;;  %v400_v10 = vld [vmem:[%s2353_s26 + $0x670] sm:$0xff] }
  0xe7   : > { %1676 = vmatpush1.bf16.xpose.msra.mxu1 %v1675_v12  ;;  %v365_v12 = vld [vmem:[%s2353_s26 + $0x558] sm:$0xff] }
  0xe8   : > { %1678 = vmatprep.subr.bf16.mxu1 %v1677_v14  ;;  %v1567_v14 = vpack.c.bf16 %v232_v7, %v228_v6  ;;  %v1697_v19 = vpack.c.bf16 %v369_v13, %v365_v12  ;;  %v268_v7 = vld [vmem:[%s2353_s26 + $0x250] sm:$0xff]  ;;  %v277_v11 = vld [vmem:[%s2353_s26 + $0x298] sm:$0xff] }
  0xe9   : > { %v281_v12 = vld [vmem:[%s2353_s26 + $0x2b8] sm:$0xff] }
  0xea   : > { %v405_v13 = vld [vmem:[%s2353_s26 + $0x698] sm:$0xff] }
  0xec   : > { %793 = vmatmul.mubr.f32.vlgmr.msra.gmra.mrb[0].mxu0 %v2510_v25 }
  0xed   : > { %1552 = vmatpush1.bf16.xpose.msra.mxu0 %v1551_v28  ;;  %863 = vmatprep.mubr.f32.mxu0 %v2515_v32  ;;  %v377_v28 = vld [vmem:[%s2353_s26 + $0x5b8] sm:$0xff] }
  0xee   : > { %935 = vmatmul.mubr.f32.vlgmr.msra.gmra.mrb[0].mxu1 %v2510_v25  ;;  %1554 = vmatprep.subr.bf16.mxu0 %v1553_v30  ;;  %v1699_v30 = vpack.c.bf16 %v368_v23, %v364_v22  ;;  %v1701_v33 = vpack.c.bf16 %v377_v28, %v373_v27  ;;  %v280_v22 = vld [vmem:[%s2353_s26 + $0x2b0] sm:$0xff]  ;;  %v289_v27 = vld [vmem:[%s2353_s26 + $0x2f8] sm:$0xff] }
  0xef   : > { %1680 = vmatpush1.bf16.xpose.msra.mxu1 %v1679_v29  ;;  %1005 = vmatprep.mubr.f32.mxu1 %v2515_v32  ;;  %v1571_v29 = vpack.c.bf16 %v240_v21, %v236_v20  ;;  %v276_v21 = vld [vmem:[%s2353_s26 + $0x290] sm:$0xff]  ;;  %v413_v28 = vld [vmem:[%s2353_s26 + $0x6d8] sm:$0xff] }
  0xf0   : > { %1682 = vmatprep.subr.bf16.mxu1 %v1681_v31  ;;  %v1573_v31 = vpack.c.bf16 %v249_v26, %v245_v24  ;;  %v404_v23 = vld [vmem:[%s2353_s26 + $0x690] sm:$0xff]  ;;  %v285_v26 = vld [vmem:[%s2353_s26 + $0x2d8] sm:$0xff] }
  0xf1   : > { %v408_v24 = vld [vmem:[%s2353_s26 + $0x6b0] sm:$0xff] }
  0xf5   : > { %1556 = vmatpush1.bf16.xpose.msra.mxu0 %v1555_v41  ;;  %v385_v41 = vld [vmem:[%s2353_s26 + $0x5f8] sm:$0xff] }
  0xf6   : > { %1558 = vmatprep.subr.bf16.mxu0 %v1557_v43  ;;  %v1703_v43 = vpack.c.bf16 %v376_v37, %v372_v36  ;;  %v1705_v45 = vpack.c.bf16 %v385_v41, %v381_v40  ;;  %v288_v36 = vld [vmem:[%s2353_s26 + $0x2f0] sm:$0xff]  ;;  %v297_v40 = vld [vmem:[%s2353_s26 + $0x338] sm:$0xff] }
  0xf7   : > { %1684 = vmatpush1.bf16.xpose.msra.mxu1 %v1683_v42  ;;  %v1575_v42 = vpack.c.bf16 %v248_v35, %v244_v34  ;;  %v284_v35 = vld [vmem:[%s2353_s26 + $0x2d0] sm:$0xff]  ;;  %v421_v41 = vld [vmem:[%s2353_s26 + $0x718] sm:$0xff] }
  0xf8   : > { %1686 = vmatprep.subr.bf16.mxu1 %v1685_v44  ;;  %v1577_v44 = vpack.c.bf16 %v257_v39, %v253_v38  ;;  %v412_v37 = vld [vmem:[%s2353_s26 + $0x6d0] sm:$0xff]  ;;  %v293_v39 = vld [vmem:[%s2353_s26 + $0x318] sm:$0xff] }
  0xf9   : > { %v416_v38 = vld [vmem:[%s2353_s26 + $0x6f0] sm:$0xff] }
  0xfd   : > { %1560 = vmatpush1.bf16.xpose.msra.mxu0 %v1559_v53  ;;  %v393_v53 = vld [vmem:[%s2353_s26 + $0x638] sm:$0xff] }
  0xfe   : > { %1562 = vmatprep.subr.bf16.mxu0 %v1561_v55  ;;  %v1707_v55 = vpack.c.bf16 %v384_v49, %v380_v48  ;;  %v1709_v57 = vpack.c.bf16 %v393_v53, %v389_v52  ;;  %v296_v48 = vld [vmem:[%s2353_s26 + $0x330] sm:$0xff]  ;;  %v305_v52 = vld [vmem:[%s2353_s26 + $0x378] sm:$0xff] }
  0xff   : > { %1688 = vmatpush1.bf16.xpose.msra.mxu1 %v1687_v54  ;;  %v1579_v54 = vpack.c.bf16 %v256_v47, %v252_v46  ;;  %v292_v47 = vld [vmem:[%s2353_s26 + $0x310] sm:$0xff]  ;;  %v429_v53 = vld [vmem:[%s2353_s26 + $0x758] sm:$0xff] }
 0x100   : > { %1690 = vmatprep.subr.bf16.mxu1 %v1689_v56  ;;  %v1581_v56 = vpack.c.bf16 %v265_v51, %v261_v50  ;;  %v420_v49 = vld [vmem:[%s2353_s26 + $0x710] sm:$0xff]  ;;  %v301_v51 = vld [vmem:[%s2353_s26 + $0x358] sm:$0xff] }
 0x101   : > { %v424_v50 = vld [vmem:[%s2353_s26 + $0x730] sm:$0xff] }
 0x105   : > { %1564 = vmatpush1.bf16.xpose.msra.mxu0 %v1563_v1  ;;  %v401_v1 = vld [vmem:[%s2353_s26 + $0x678] sm:$0xff] }
 0x106   : > { %1566 = vmatprep.subr.bf16.mxu0 %v1565_v4  ;;  %v1711_v4 = vpack.c.bf16 %v392_v61, %v388_v60  ;;  %v1713_v6 = vpack.c.bf16 %v401_v1, %v397_v0  ;;  %v304_v60 = vld [vmem:[%s2353_s26 + $0x370] sm:$0xff]  ;;  %v313_v0 = vld [vmem:[%s2353_s26 + $0x3b8] sm:$0xff] }
 0x107   : > { %1692 = vmatpush1.bf16.xpose.msra.mxu1 %v1691_v2  ;;  %v1583_v2 = vpack.c.bf16 %v264_v59, %v260_v58  ;;  %v300_v59 = vld [vmem:[%s2353_s26 + $0x350] sm:$0xff]  ;;  %v437_v1 = vld [vmem:[%s2353_s26 + $0x798] sm:$0xff] }
 0x108   : > { %1694 = vmatprep.subr.bf16.mxu1 %v1693_v5  ;;  %v1585_v5 = vpack.c.bf16 %v273_v63, %v269_v62  ;;  %v428_v61 = vld [vmem:[%s2353_s26 + $0x750] sm:$0xff]  ;;  %v309_v63 = vld [vmem:[%s2353_s26 + $0x398] sm:$0xff] }
 0x109   : > { %v432_v62 = vld [vmem:[%s2353_s26 + $0x770] sm:$0xff] }
 0x10d   : > { %1568 = vmatpush1.bf16.xpose.msra.mxu0 %v1567_v14  ;;  %v409_v14 = vld [vmem:[%s2353_s26 + $0x6b8] sm:$0xff] }
 0x10e   : > { %1570 = vmatprep.subr.bf16.mxu0 %v1569_v16  ;;  %v1715_v16 = vpack.c.bf16 %v400_v10, %v396_v9  ;;  %v1717_v20 = vpack.c.bf16 %v409_v14, %v405_v13  ;;  %v312_v9 = vld [vmem:[%s2353_s26 + $0x3b0] sm:$0xff]  ;;  %v321_v13 = vld [vmem:[%s2353_s26 + $0x3f8] sm:$0xff] }
 0x10f   : > { %1696 = vmatpush1.bf16.xpose.msra.mxu1 %v1695_v15  ;;  %v1587_v15 = vpack.c.bf16 %v272_v8, %v268_v7  ;;  %v308_v8 = vld [vmem:[%s2353_s26 + $0x390] sm:$0xff]  ;;  %v445_v14 = vld [vmem:[%s2353_s26 + $0x7d8] sm:$0xff] }
 0x110   : > { %1698 = vmatprep.subr.bf16.mxu1 %v1697_v19  ;;  %v1589_v19 = vpack.c.bf16 %v281_v12, %v277_v11  ;;  %v436_v10 = vld [vmem:[%s2353_s26 + $0x790] sm:$0xff]  ;;  %v317_v12 = vld [vmem:[%s2353_s26 + $0x3d8] sm:$0xff] }
 0x111   : > { %v440_v11 = vld [vmem:[%s2353_s26 + $0x7b0] sm:$0xff] }
 0x115   : > { %1572 = vmatpush1.bf16.xpose.msra.mxu0 %v1571_v29  ;;  %v417_v29 = vld [vmem:[%s2353_s26 + $0x6f8] sm:$0xff] }
 0x116   : > { %1574 = vmatprep.subr.bf16.mxu0 %v1573_v31  ;;  %v1719_v31 = vpack.c.bf16 %v408_v24, %v404_v23  ;;  %v1721_v34 = vpack.c.bf16 %v417_v29, %v413_v28  ;;  %v320_v23 = vld [vmem:[%s2353_s26 + $0x3f0] sm:$0xff]  ;;  %v455_v28 = vld [vmem:[%s2353_s26 + $0x828] sm:$0xff] }
 0x117   : > { %1700 = vmatpush1.bf16.xpose.msra.mxu1 %v1699_v30  ;;  %v1591_v30 = vpack.c.bf16 %v280_v22, %v276_v21  ;;  %v316_v22 = vld [vmem:[%s2353_s26 + $0x3d0] sm:$0xff]  ;;  %v579_v29 = vld [vmem:[%s2353_s26 + $0xc08] sm:$0xff] }
 0x118   : > { %1702 = vmatprep.subr.bf16.mxu1 %v1701_v33  ;;  %v1593_v33 = vpack.c.bf16 %v289_v27, %v285_v26  ;;  %v444_v24 = vld [vmem:[%s2353_s26 + $0x7d0] sm:$0xff]  ;;  %v451_v27 = vld [vmem:[%s2353_s26 + $0x808] sm:$0xff] }
 0x119   : > { %v448_v26 = vld [vmem:[%s2353_s26 + $0x7f0] sm:$0xff] }
 0x11d   : > { %1576 = vmatpush1.bf16.xpose.msra.mxu0 %v1575_v42  ;;  %v425_v42 = vld [vmem:[%s2353_s26 + $0x738] sm:$0xff] }
 0x11e   : > { %1578 = vmatprep.subr.bf16.mxu0 %v1577_v44  ;;  %v1723_v44 = vpack.c.bf16 %v416_v38, %v412_v37  ;;  %v1725_v46 = vpack.c.bf16 %v425_v42, %v421_v41  ;;  %v450_v37 = vld [vmem:[%s2353_s26 + $0x800] sm:$0xff]  ;;  %v459_v41 = vld [vmem:[%s2353_s26 + $0x848] sm:$0xff] }
 0x11f   : > { %1704 = vmatpush1.bf16.xpose.msra.mxu1 %v1703_v43  ;;  %v1595_v43 = vpack.c.bf16 %v288_v36, %v284_v35  ;;  %v718_v36 = vsub.s32 2, %v2403_v3  ;;  %v454_v38 = vld [vmem:[%s2353_s26 + $0x820] sm:$0xff]  ;;  %v463_v42 = vld [vmem:[%s2353_s26 + $0x868] sm:$0xff] }
 0x120   : > { %1706 = vmatprep.subr.bf16.mxu1 %v1705_v45  ;;  %v1597_v45 = vpack.c.bf16 %v297_v40, %v293_v39  ;;  %v578_v39 = vld [vmem:[%s2353_s26 + $0xc00] sm:$0xff] }
 0x121   : > { %v582_v40 = vld [vmem:[%s2353_s26 + $0xc20] sm:$0xff] }
 0x125   : > { %1580 = vmatpush1.bf16.xpose.msra.mxu0 %v1579_v54  ;;  %v433_v54 = vld [vmem:[%s2353_s26 + $0x778] sm:$0xff] }
 0x126   : > { %1582 = vmatprep.subr.bf16.mxu0 %v1581_v56  ;;  %v1727_v56 = vpack.c.bf16 %v424_v50, %v420_v49  ;;  %v1729_v58 = vpack.c.bf16 %v433_v54, %v429_v53  ;;  %v462_v50 = vld [vmem:[%s2353_s26 + $0x860] sm:$0xff]  ;;  %v467_v53 = vld [vmem:[%s2353_s26 + $0x888] sm:$0xff] }
 0x127   : > { %1708 = vmatpush1.bf16.xpose.msra.mxu1 %v1707_v55  ;;  %v1599_v55 = vpack.c.bf16 %v296_v48, %v292_v47  ;;  %v1871_v47 = vpack.c.bf16 %v582_v40, %v578_v39  ;;  %v1745_v48 = vpack.c.bf16 %v463_v42, %v459_v41  ;;  %v471_v54 = vld [vmem:[%s2353_s26 + $0x8a8] sm:$0xff]  ;;  %v618_v39 = vld [vmem:[%s2353_s26 + $0xd40] sm:$0xff] }
 0x128   : > { %1710 = vmatprep.subr.bf16.mxu1 %v1709_v57  ;;  %v1601_v57 = vpack.c.bf16 %v305_v52, %v301_v51  ;;  %v586_v51 = vld [vmem:[%s2353_s26 + $0xc40] sm:$0xff]  ;;  %v499_v41 = vld [vmem:[%s2353_s26 + $0x988] sm:$0xff] }
 0x129   : > { %v590_v52 = vld [vmem:[%s2353_s26 + $0xc60] sm:$0xff]  ;;  %v503_v42 = vld [vmem:[%s2353_s26 + $0x9a8] sm:$0xff] }
 0x12a   : > { %v622_v40 = vld [vmem:[%s2353_s26 + $0xd60] sm:$0xff] }
 0x12d   : > { %1584 = vmatpush1.bf16.xpose.msra.mxu0 %v1583_v2  ;;  %v441_v2 = vld [vmem:[%s2353_s26 + $0x7b8] sm:$0xff] }
 0x12e   : > { %1586 = vmatprep.subr.bf16.mxu0 %v1585_v5  ;;  %v1731_v5 = vpack.c.bf16 %v432_v62, %v428_v61  ;;  %v1733_v7 = vpack.c.bf16 %v441_v2, %v437_v1  ;;  %v466_v61 = vld [vmem:[%s2353_s26 + $0x880] sm:$0xff]  ;;  %v475_v1 = vld [vmem:[%s2353_s26 + $0x8c8] sm:$0xff] }
 0x12f   : > { %1712 = vmatpush1.bf16.xpose.msra.mxu1 %v1711_v4  ;;  %v1603_v4 = vpack.c.bf16 %v304_v60, %v300_v59  ;;  %v1749_v59 = vpack.c.bf16 %v471_v54, %v467_v53  ;;  %v470_v62 = vld [vmem:[%s2353_s26 + $0x8a0] sm:$0xff]  ;;  %v603_v2 = vld [vmem:[%s2353_s26 + $0xcc8] sm:$0xff] }
 0x130   : > { %1714 = vmatprep.subr.bf16.mxu1 %v1713_v6  ;;  %v1605_v6 = vpack.c.bf16 %v313_v0, %v309_v63  ;;  %v594_v63 = vld [vmem:[%s2353_s26 + $0xc80] sm:$0xff]  ;;  %v507_v53 = vld [vmem:[%s2353_s26 + $0x9c8] sm:$0xff] }
 0x131   : > { %v598_v0 = vld [vmem:[%s2353_s26 + $0xca0] sm:$0xff]  ;;  %v511_v54 = vld [vmem:[%s2353_s26 + $0x9e8] sm:$0xff] }
 0x135   : > { %1588 = vmatpush1.bf16.xpose.msra.mxu0 %v1587_v15  ;;  %v449_v15 = vld [vmem:[%s2353_s26 + $0x7f8] sm:$0xff] }
 0x136   : > { %1590 = vmatprep.subr.bf16.mxu0 %v1589_v19  ;;  %v1735_v19 = vpack.c.bf16 %v440_v11, %v436_v10  ;;  %v1737_v21 = vpack.c.bf16 %v449_v15, %v445_v14  ;;  %v478_v10 = vld [vmem:[%s2353_s26 + $0x8e0] sm:$0xff]  ;;  %v487_v14 = vld [vmem:[%s2353_s26 + $0x928] sm:$0xff] }
 0x137   : > { %1716 = vmatpush1.bf16.xpose.msra.mxu1 %v1715_v16  ;;  %v1607_v16 = vpack.c.bf16 %v312_v9, %v308_v8  ;;  %v474_v9 = vld [vmem:[%s2353_s26 + $0x8c0] sm:$0xff]  ;;  %v611_v15 = vld [vmem:[%s2353_s26 + $0xd08] sm:$0xff] }
 0x138   : > { %1718 = vmatprep.subr.bf16.mxu1 %v1717_v20  ;;  %v1609_v20 = vpack.c.bf16 %v321_v13, %v317_v12  ;;  %v602_v11 = vld [vmem:[%s2353_s26 + $0xcc0] sm:$0xff]  ;;  %v483_v13 = vld [vmem:[%s2353_s26 + $0x908] sm:$0xff] }
 0x139   : > { %v606_v12 = vld [vmem:[%s2353_s26 + $0xce0] sm:$0xff] }
 0x13d   : > { %1592 = vmatpush1.bf16.xpose.msra.mxu0 %v1591_v30  ;;  %v583_v30 = vld [vmem:[%s2353_s26 + $0xc28] sm:$0xff] }
 0x13e   : > { %1594 = vmatprep.subr.bf16.mxu0 %v1593_v33  ;;  %v1739_v33 = vpack.c.bf16 %v448_v26, %v444_v24  ;;  %v1869_v35 = vpack.c.bf16 %v583_v30, %v579_v29  ;;  %v486_v24 = vld [vmem:[%s2353_s26 + $0x920] sm:$0xff]  ;;  %v495_v29 = vld [vmem:[%s2353_s26 + $0x968] sm:$0xff] }
 0x13f   : > { %1720 = vmatpush1.bf16.xpose.msra.mxu1 %v1719_v31  ;;  %v1611_v31 = vpack.c.bf16 %v320_v23, %v316_v22  ;;  %v482_v23 = vld [vmem:[%s2353_s26 + $0x900] sm:$0xff]  ;;  %v619_v30 = vld [vmem:[%s2353_s26 + $0xd48] sm:$0xff] }
 0x140   : > { %1722 = vmatprep.subr.bf16.mxu1 %v1721_v34  ;;  %v1741_v34 = vpack.c.bf16 %v455_v28, %v451_v27  ;;  %v610_v26 = vld [vmem:[%s2353_s26 + $0xd00] sm:$0xff]  ;;  %v491_v28 = vld [vmem:[%s2353_s26 + $0x948] sm:$0xff] }
 0x141   : > { %v614_v27 = vld [vmem:[%s2353_s26 + $0xd20] sm:$0xff] }
 0x145   : > { %1596 = vmatpush1.bf16.xpose.msra.mxu0 %v1595_v43  ;;  %v2649_v43 = vrot.slane %v2414_v17, %v718_v36  ;;  %v458_v17 = vld [vmem:[%s2353_s26 + $0x840] sm:$0xff] }
 0x146   : > { %1598 = vmatprep.subr.bf16.mxu0 %v1597_v45  ;;  %v591_v45 = vld [vmem:[%s2353_s26 + $0xc68] sm:$0xff] }
 0x147   : > { %1724 = vmatpush1.bf16.xpose.msra.mxu1 %v1723_v44  ;;  %v587_v44 = vld [vmem:[%s2353_s26 + $0xc48] sm:$0xff] }
 0x148   : > { %1726 = vmatprep.subr.bf16.mxu1 %v1725_v46  ;;  %v1743_v46 = vpack.c.bf16 %v454_v38, %v450_v37  ;;  %v1873_v49 = vpack.c.bf16 %v591_v45, %v587_v44  ;;  %v490_v37 = vld [vmem:[%s2353_s26 + $0x940] sm:$0xff]  ;;  %v627_v44 = vld [vmem:[%s2353_s26 + $0xd88] sm:$0xff] }
 0x149   : > { %v494_v38 = vld [vmem:[%s2353_s26 + $0x960] sm:$0xff]  ;;  %v631_v45 = vld [vmem:[%s2353_s26 + $0xda8] sm:$0xff] }
 0x14d   : > { %1600 = vmatpush1.bf16.xpose.msra.mxu0 %v1599_v55  ;;  %v595_v55 = vld [vmem:[%s2353_s26 + $0xc88] sm:$0xff] }
 0x14e   : > { %1602 = vmatprep.subr.bf16.mxu0 %v1601_v57  ;;  %v1747_v57 = vpack.c.bf16 %v462_v50, %v458_v17  ;;  %v498_v17 = vld [vmem:[%s2353_s26 + $0x980] sm:$0xff] }
 0x14f   : > { %1728 = vmatpush1.bf16.xpose.msra.mxu1 %v1727_v56  ;;  %v599_v56 = vld [vmem:[%s2353_s26 + $0xca8] sm:$0xff]  ;;  %v502_v50 = vld [vmem:[%s2353_s26 + $0x9a0] sm:$0xff] }
 0x150   : > { %1730 = vmatprep.subr.bf16.mxu1 %v1729_v58  ;;  %v1875_v58 = vpack.c.bf16 %v590_v52, %v586_v51  ;;  %v1877_v60 = vpack.c.bf16 %v599_v56, %v595_v55  ;;  %v626_v51 = vld [vmem:[%s2353_s26 + $0xd80] sm:$0xff]  ;;  %v635_v55 = vld [vmem:[%s2353_s26 + $0xdc8] sm:$0xff] }
 0x151   : > { %v630_v52 = vld [vmem:[%s2353_s26 + $0xda0] sm:$0xff]  ;;  %v639_v56 = vld [vmem:[%s2353_s26 + $0xde8] sm:$0xff] }
 0x155   : > { %1604 = vmatpush1.bf16.xpose.msra.mxu0 %v1603_v4  ;;  %v607_v4 = vld [vmem:[%s2353_s26 + $0xce8] sm:$0xff] }
 0x156   : > { %1606 = vmatprep.subr.bf16.mxu0 %v1605_v6  ;;  %v1879_v6 = vpack.c.bf16 %v598_v0, %v594_v63  ;;  %v1881_v8 = vpack.c.bf16 %v607_v4, %v603_v2  ;;  %v634_v63 = vld [vmem:[%s2353_s26 + $0xdc0] sm:$0xff]  ;;  %v643_v2 = vld [vmem:[%s2353_s26 + $0xe08] sm:$0xff] }
 0x157   : > { %1732 = vmatpush1.bf16.xpose.msra.mxu1 %v1731_v5  ;;  %v1751_v5 = vpack.c.bf16 %v470_v62, %v466_v61  ;;  %v506_v61 = vld [vmem:[%s2353_s26 + $0x9c0] sm:$0xff]  ;;  %v647_v4 = vld [vmem:[%s2353_s26 + $0xe28] sm:$0xff] }
 0x158   : > { %1734 = vmatprep.subr.bf16.mxu1 %v1733_v7  ;;  %v510_v62 = vld [vmem:[%s2353_s26 + $0x9e0] sm:$0xff] }
 0x159   : > { %v638_v0 = vld [vmem:[%s2353_s26 + $0xde0] sm:$0xff] }
 0x15d   : > { %1608 = vmatpush1.bf16.xpose.msra.mxu0 %v1607_v16  ;;  %v615_v16 = vld [vmem:[%s2353_s26 + $0xd28] sm:$0xff] }
 0x15e   : > { %1610 = vmatprep.subr.bf16.mxu0 %v1609_v20  ;;  %v1883_v20 = vpack.c.bf16 %v606_v12, %v602_v11  ;;  %v1885_v22 = vpack.c.bf16 %v615_v16, %v611_v15  ;;  %v642_v11 = vld [vmem:[%s2353_s26 + $0xe00] sm:$0xff]  ;;  %v651_v15 = vld [vmem:[%s2353_s26 + $0xe48] sm:$0xff] }
 0x15f   : > { %1736 = vmatpush1.bf16.xpose.msra.mxu1 %v1735_v19  ;;  %v1755_v19 = vpack.c.bf16 %v478_v10, %v474_v9  ;;  %v514_v9 = vld [vmem:[%s2353_s26 + $0xa00] sm:$0xff]  ;;  %v655_v16 = vld [vmem:[%s2353_s26 + $0xe68] sm:$0xff] }
 0x160   : > { %1738 = vmatprep.subr.bf16.mxu1 %v1737_v21  ;;  %v1757_v21 = vpack.c.bf16 %v487_v14, %v483_v13  ;;  %v518_v10 = vld [vmem:[%s2353_s26 + $0xa20] sm:$0xff]  ;;  %v523_v13 = vld [vmem:[%s2353_s26 + $0xa48] sm:$0xff] }
 0x161   : > { %v646_v12 = vld [vmem:[%s2353_s26 + $0xe20] sm:$0xff]  ;;  %v527_v14 = vld [vmem:[%s2353_s26 + $0xa68] sm:$0xff] }
 0x165   : > { %1612 = vmatpush1.bf16.xpose.msra.mxu0 %v1611_v31  ;;  %v623_v31 = vld [vmem:[%s2353_s26 + $0xd68] sm:$0xff] }
 0x166   : > { %1742 = vmatprep.subr.bf16.mxu0 %v1741_v34  ;;  %v1887_v34 = vpack.c.bf16 %v614_v27, %v610_v26  ;;  %v1889_v36 = vpack.c.bf16 %v623_v31, %v619_v30  ;;  %v650_v26 = vld [vmem:[%s2353_s26 + $0xe40] sm:$0xff]  ;;  %v659_v30 = vld [vmem:[%s2353_s26 + $0xe88] sm:$0xff] }
 0x167   : > { %1740 = vmatpush1.bf16.xpose.msra.mxu1 %v1739_v33  ;;  %v1759_v33 = vpack.c.bf16 %v486_v24, %v482_v23  ;;  %v522_v23 = vld [vmem:[%s2353_s26 + $0xa40] sm:$0xff]  ;;  %v663_v31 = vld [vmem:[%s2353_s26 + $0xea8] sm:$0xff] }
 0x168   : > { %1870 = vmatprep.subr.bf16.mxu1 %v1869_v35  ;;  %v1761_v35 = vpack.c.bf16 %v495_v29, %v491_v28  ;;  %v526_v24 = vld [vmem:[%s2353_s26 + $0xa60] sm:$0xff]  ;;  %v531_v28 = vld [vmem:[%s2353_s26 + $0xa88] sm:$0xff] }
 0x169   : > { %v654_v27 = vld [vmem:[%s2353_s26 + $0xe60] sm:$0xff]  ;;  %v535_v29 = vld [vmem:[%s2353_s26 + $0xaa8] sm:$0xff] }
 0x16c   : > { %864 = vmatmul.mubr.f32.vlgmr.msra.gmra.mrb[0].mxu0 %v2649_v43 }
 0x16d   : > { %1744 = vmatpush1.bf16.xpose.msra.mxu0 %v1743_v46  ;;  %1076 = vmatprep.mubr.f32.mxu0 %v2417_v18  ;;  %v1763_v46 = vpack.c.bf16 %v494_v38, %v490_v37  ;;  %v530_v37 = vld [vmem:[%s2353_s26 + $0xa80] sm:$0xff] }
 0x16e   : > { %1006 = vmatmul.mubr.f32.vlgmr.msra.gmra.mrb[0].mxu1 %v2649_v43  ;;  %1746 = vmatprep.subr.bf16.mxu0 %v1745_v48  ;;  %v1765_v48 = vpack.c.bf16 %v503_v42, %v499_v41  ;;  %v534_v38 = vld [vmem:[%s2353_s26 + $0xaa0] sm:$0xff]  ;;  %v539_v41 = vld [vmem:[%s2353_s26 + $0xac8] sm:$0xff] }
 0x16f   : > { %1872 = vmatpush1.bf16.xpose.msra.mxu1 %v1871_v47  ;;  %1218 = vmatprep.mubr.f32.mxu1 %v2417_v18  ;;  %v479_v18 = vld [vmem:[%s2353_s26 + $0x8e8] sm:$0xff]  ;;  %v1891_v47 = vpack.c.bf16 %v622_v40, %v618_v39  ;;  %v658_v39 = vld [vmem:[%s2353_s26 + $0xe80] sm:$0xff] }
 0x170   : > { %1874 = vmatprep.subr.bf16.mxu1 %v1873_v49  ;;  %v1753_v7 = vpack.c.bf16 %v479_v18, %v475_v1  ;;  %v1893_v49 = vpack.c.bf16 %v631_v45, %v627_v44  ;;  %v515_v1 = vld [vmem:[%s2353_s26 + $0xa08] sm:$0xff]  ;;  %v662_v40 = vld [vmem:[%s2353_s26 + $0xea0] sm:$0xff] }
 0x171   : > { %v519_v18 = vld [vmem:[%s2353_s26 + $0xa28] sm:$0xff] }
 0x172   : > { %v543_v42 = vld [vmem:[%s2353_s26 + $0xae8] sm:$0xff] }
 0x173   : > { %v667_v44 = vld [vmem:[%s2353_s26 + $0xec8] sm:$0xff] }
 0x174   : > { %v671_v45 = vld [vmem:[%s2353_s26 + $0xee8] sm:$0xff] }
 0x175   : > { %1748 = vmatpush1.bf16.xpose.msra.mxu0 %v1747_v57  ;;  %v1767_v57 = vpack.c.bf16 %v502_v50, %v498_v17  ;;  %v538_v17 = vld [vmem:[%s2353_s26 + $0xac0] sm:$0xff] }
 0x176   : > { %1750 = vmatprep.subr.bf16.mxu0 %v1749_v59  ;;  %v1769_v59 = vpack.c.bf16 %v511_v54, %v507_v53  ;;  %v542_v50 = vld [vmem:[%s2353_s26 + $0xae0] sm:$0xff]  ;;  %v547_v53 = vld [vmem:[%s2353_s26 + $0xb08] sm:$0xff] }
 0x177   : > { %1876 = vmatpush1.bf16.xpose.msra.mxu1 %v1875_v58  ;;  %v1895_v58 = vpack.c.bf16 %v630_v52, %v626_v51  ;;  %v666_v51 = vld [vmem:[%s2353_s26 + $0xec0] sm:$0xff]  ;;  %v551_v54 = vld [vmem:[%s2353_s26 + $0xb28] sm:$0xff] }
 0x178   : > { %1878 = vmatprep.subr.bf16.mxu1 %v1877_v60  ;;  %v1897_v60 = vpack.c.bf16 %v639_v56, %v635_v55  ;;  %v670_v52 = vld [vmem:[%s2353_s26 + $0xee0] sm:$0xff]  ;;  %v675_v55 = vld [vmem:[%s2353_s26 + $0xf08] sm:$0xff] }
 0x179   : > { %v679_v56 = vld [vmem:[%s2353_s26 + $0xf28] sm:$0xff] }
 0x17d   : > { %1752 = vmatpush1.bf16.xpose.msra.mxu0 %v1751_v5  ;;  %v1771_v5 = vpack.c.bf16 %v510_v62, %v506_v61  ;;  %v546_v61 = vld [vmem:[%s2353_s26 + $0xb00] sm:$0xff] }
 0x17e   : > { %1754 = vmatprep.subr.bf16.mxu0 %v1753_v7  ;;  %v1773_v7 = vpack.c.bf16 %v519_v18, %v515_v1  ;;  %v550_v62 = vld [vmem:[%s2353_s26 + $0xb20] sm:$0xff]  ;;  %v555_v1 = vld [vmem:[%s2353_s26 + $0xb48] sm:$0xff] }
 0x17f   : > { %1880 = vmatpush1.bf16.xpose.msra.mxu1 %v1879_v6  ;;  %v1899_v6 = vpack.c.bf16 %v638_v0, %v634_v63  ;;  %v674_v63 = vld [vmem:[%s2353_s26 + $0xf00] sm:$0xff]  ;;  %v559_v18 = vld [vmem:[%s2353_s26 + $0xb68] sm:$0xff] }
 0x180   : > { %1882 = vmatprep.subr.bf16.mxu1 %v1881_v8  ;;  %v1901_v8 = vpack.c.bf16 %v647_v4, %v643_v2  ;;  %v678_v0 = vld [vmem:[%s2353_s26 + $0xf20] sm:$0xff]  ;;  %v683_v2 = vld [vmem:[%s2353_s26 + $0xf48] sm:$0xff] }
 0x181   : > { %v687_v4 = vld [vmem:[%s2353_s26 + $0xf68] sm:$0xff] }
 0x185   : > { %1756 = vmatpush1.bf16.xpose.msra.mxu0 %v1755_v19  ;;  %v1775_v19 = vpack.c.bf16 %v518_v10, %v514_v9  ;;  %v554_v9 = vld [vmem:[%s2353_s26 + $0xb40] sm:$0xff] }
 0x186   : > { %1758 = vmatprep.subr.bf16.mxu0 %v1757_v21  ;;  %v1777_v21 = vpack.c.bf16 %v527_v14, %v523_v13  ;;  %v558_v10 = vld [vmem:[%s2353_s26 + $0xb60] sm:$0xff]  ;;  %v563_v13 = vld [vmem:[%s2353_s26 + $0xb88] sm:$0xff] }
 0x187   : > { %1884 = vmatpush1.bf16.xpose.msra.mxu1 %v1883_v20  ;;  %v1903_v20 = vpack.c.bf16 %v646_v12, %v642_v11  ;;  %v682_v11 = vld [vmem:[%s2353_s26 + $0xf40] sm:$0xff]  ;;  %v567_v14 = vld [vmem:[%s2353_s26 + $0xba8] sm:$0xff] }
 0x188   : > { %1886 = vmatprep.subr.bf16.mxu1 %v1885_v22  ;;  %v1905_v22 = vpack.c.bf16 %v655_v16, %v651_v15  ;;  %v686_v12 = vld [vmem:[%s2353_s26 + $0xf60] sm:$0xff]  ;;  %v691_v15 = vld [vmem:[%s2353_s26 + $0xf88] sm:$0xff] }
 0x189   : > { %v695_v16 = vld [vmem:[%s2353_s26 + $0xfa8] sm:$0xff] }
 0x18d   : > { %1760 = vmatpush1.bf16.xpose.msra.mxu0 %v1759_v33  ;;  %v1779_v33 = vpack.c.bf16 %v526_v24, %v522_v23  ;;  %v562_v23 = vld [vmem:[%s2353_s26 + $0xb80] sm:$0xff] }
 0x18e   : > { %1762 = vmatprep.subr.bf16.mxu0 %v1761_v35  ;;  %v1781_v35 = vpack.c.bf16 %v535_v29, %v531_v28  ;;  %v566_v24 = vld [vmem:[%s2353_s26 + $0xba0] sm:$0xff]  ;;  %v571_v28 = vld [vmem:[%s2353_s26 + $0xbc8] sm:$0xff] }
 0x18f   : > { %1888 = vmatpush1.bf16.xpose.msra.mxu1 %v1887_v34  ;;  %v1907_v34 = vpack.c.bf16 %v654_v27, %v650_v26  ;;  %v690_v26 = vld [vmem:[%s2353_s26 + $0xf80] sm:$0xff]  ;;  %v575_v29 = vld [vmem:[%s2353_s26 + $0xbe8] sm:$0xff] }
 0x190   : > { %1890 = vmatprep.subr.bf16.mxu1 %v1889_v36  ;;  %v1909_v36 = vpack.c.bf16 %v663_v31, %v659_v30  ;;  %v694_v27 = vld [vmem:[%s2353_s26 + $0xfa0] sm:$0xff]  ;;  %v699_v30 = vld [vmem:[%s2353_s26 + $0xfc8] sm:$0xff] }
 0x191   : > { %v703_v31 = vld [vmem:[%s2353_s26 + $0xfe8] sm:$0xff] }
 0x195   : > { %1764 = vmatpush1.bf16.xpose.msra.mxu0 %v1763_v46  ;;  %v1783_v46 = vpack.c.bf16 %v534_v38, %v530_v37  ;;  %v570_v37 = vld [vmem:[%s2353_s26 + $0xbc0] sm:$0xff] }
 0x196   : > { %1766 = vmatprep.subr.bf16.mxu0 %v1765_v48  ;;  %v1785_v48 = vpack.c.bf16 %v543_v42, %v539_v41  ;;  %v574_v38 = vld [vmem:[%s2353_s26 + $0xbe0] sm:$0xff]  ;;  %v453_v41 = vld [vmem:[%s2353_s26 + $0x818] sm:$0xff] }
 0x197   : > { %1892 = vmatpush1.bf16.xpose.msra.mxu1 %v1891_v47  ;;  %v1911_v47 = vpack.c.bf16 %v662_v40, %v658_v39  ;;  %v698_v39 = vld [vmem:[%s2353_s26 + $0xfc0] sm:$0xff]  ;;  %v457_v42 = vld [vmem:[%s2353_s26 + $0x838] sm:$0xff] }
 0x198   : > { %1894 = vmatprep.subr.bf16.mxu1 %v1893_v49  ;;  %v1913_v49 = vpack.c.bf16 %v671_v45, %v667_v44  ;;  %v702_v40 = vld [vmem:[%s2353_s26 + $0xfe0] sm:$0xff]  ;;  %v581_v44 = vld [vmem:[%s2353_s26 + $0xc18] sm:$0xff] }
 0x199   : > { %v585_v45 = vld [vmem:[%s2353_s26 + $0xc38] sm:$0xff] }
 0x19d   : > { %1768 = vmatpush1.bf16.xpose.msra.mxu0 %v1767_v57  ;;  %v1787_v57 = vpack.c.bf16 %v542_v50, %v538_v17  ;;  %v452_v17 = vld [vmem:[%s2353_s26 + $0x810] sm:$0xff] }
 0x19e   : > { %1770 = vmatprep.subr.bf16.mxu0 %v1769_v59  ;;  %v1789_v59 = vpack.c.bf16 %v551_v54, %v547_v53  ;;  %v456_v50 = vld [vmem:[%s2353_s26 + $0x830] sm:$0xff]  ;;  %v461_v53 = vld [vmem:[%s2353_s26 + $0x858] sm:$0xff] }
 0x19f   : > { %1896 = vmatpush1.bf16.xpose.msra.mxu1 %v1895_v58  ;;  %v1915_v58 = vpack.c.bf16 %v670_v52, %v666_v51  ;;  %v580_v51 = vld [vmem:[%s2353_s26 + $0xc10] sm:$0xff]  ;;  %v465_v54 = vld [vmem:[%s2353_s26 + $0x878] sm:$0xff] }
 0x1a0   : > { %1898 = vmatprep.subr.bf16.mxu1 %v1897_v60  ;;  %v1917_v60 = vpack.c.bf16 %v679_v56, %v675_v55  ;;  %v584_v52 = vld [vmem:[%s2353_s26 + $0xc30] sm:$0xff]  ;;  %v589_v55 = vld [vmem:[%s2353_s26 + $0xc58] sm:$0xff] }
 0x1a1   : > { %v593_v56 = vld [vmem:[%s2353_s26 + $0xc78] sm:$0xff] }
 0x1a5   : > { %1772 = vmatpush1.bf16.xpose.msra.mxu0 %v1771_v5  ;;  %v1791_v5 = vpack.c.bf16 %v550_v62, %v546_v61  ;;  %v460_v61 = vld [vmem:[%s2353_s26 + $0x850] sm:$0xff] }
 0x1a6   : > { %1774 = vmatprep.subr.bf16.mxu0 %v1773_v7  ;;  %v1793_v7 = vpack.c.bf16 %v559_v18, %v555_v1  ;;  %v464_v62 = vld [vmem:[%s2353_s26 + $0x870] sm:$0xff]  ;;  %v469_v1 = vld [vmem:[%s2353_s26 + $0x898] sm:$0xff] }
 0x1a7   : > { %1900 = vmatpush1.bf16.xpose.msra.mxu1 %v1899_v6  ;;  %v1919_v6 = vpack.c.bf16 %v678_v0, %v674_v63  ;;  %v588_v63 = vld [vmem:[%s2353_s26 + $0xc50] sm:$0xff]  ;;  %v473_v18 = vld [vmem:[%s2353_s26 + $0x8b8] sm:$0xff] }
 0x1a8   : > { %1902 = vmatprep.subr.bf16.mxu1 %v1901_v8  ;;  %v1921_v8 = vpack.c.bf16 %v687_v4, %v683_v2  ;;  %v592_v0 = vld [vmem:[%s2353_s26 + $0xc70] sm:$0xff]  ;;  %v597_v2 = vld [vmem:[%s2353_s26 + $0xc98] sm:$0xff] }
 0x1a9   : > { %v601_v4 = vld [vmem:[%s2353_s26 + $0xcb8] sm:$0xff] }
 0x1ad   : > { %1776 = vmatpush1.bf16.xpose.msra.mxu0 %v1775_v19  ;;  %v1795_v19 = vpack.c.bf16 %v558_v10, %v554_v9  ;;  %v472_v9 = vld [vmem:[%s2353_s26 + $0x8b0] sm:$0xff] }
 0x1ae   : > { %1778 = vmatprep.subr.bf16.mxu0 %v1777_v21  ;;  %v1797_v21 = vpack.c.bf16 %v567_v14, %v563_v13  ;;  %v596_v10 = vld [vmem:[%s2353_s26 + $0xc90] sm:$0xff]  ;;  %v605_v13 = vld [vmem:[%s2353_s26 + $0xcd8] sm:$0xff] }
 0x1af   : > { %1904 = vmatpush1.bf16.xpose.msra.mxu1 %v1903_v20  ;;  %v1923_v20 = vpack.c.bf16 %v686_v12, %v682_v11  ;;  %v600_v11 = vld [vmem:[%s2353_s26 + $0xcb0] sm:$0xff]  ;;  %v477_v12 = vld [vmem:[%s2353_s26 + $0x8d8] sm:$0xff] }
 0x1b0   : > { %1906 = vmatprep.subr.bf16.mxu1 %v1905_v22  ;;  %v1925_v22 = vpack.c.bf16 %v695_v16, %v691_v15  ;;  %v609_v14 = vld [vmem:[%s2353_s26 + $0xcf8] sm:$0xff]  ;;  %v1943_v16 = vpack.c.bf16 %v600_v11, %v596_v10 }
 0x1b1   : > { %v517_v10 = vld [vmem:[%s2353_s26 + $0xa18] sm:$0xff] }
 0x1b2   : > { %v521_v11 = vld [vmem:[%s2353_s26 + $0xa38] sm:$0xff] }
 0x1b5   : > { %1780 = vmatpush1.bf16.xpose.msra.mxu0 %v1779_v33  ;;  %v1799_v33 = vpack.c.bf16 %v566_v24, %v562_v23  ;;  %v604_v23 = vld [vmem:[%s2353_s26 + $0xcd0] sm:$0xff] }
 0x1b6   : > { %1782 = vmatprep.subr.bf16.mxu0 %v1781_v35  ;;  %v1801_v35 = vpack.c.bf16 %v575_v29, %v571_v28  ;;  %v608_v24 = vld [vmem:[%s2353_s26 + $0xcf0] sm:$0xff]  ;;  %v613_v28 = vld [vmem:[%s2353_s26 + $0xd18] sm:$0xff] }
 0x1b7   : > { %1908 = vmatpush1.bf16.xpose.msra.mxu1 %v1907_v34  ;;  %v1927_v34 = vpack.c.bf16 %v694_v27, %v690_v26  ;;  %v485_v26 = vld [vmem:[%s2353_s26 + $0x918] sm:$0xff] }
 0x1b8   : > { %1910 = vmatprep.subr.bf16.mxu1 %v1909_v36  ;;  %v1929_v36 = vpack.c.bf16 %v703_v31, %v699_v30  ;;  %v489_v27 = vld [vmem:[%s2353_s26 + $0x938] sm:$0xff]  ;;  %v1947_v31 = vpack.c.bf16 %v608_v24, %v604_v23 }
 0x1b9   : > { %v617_v29 = vld [vmem:[%s2353_s26 + $0xd38] sm:$0xff] }
 0x1ba   : > { %v525_v23 = vld [vmem:[%s2353_s26 + $0xa58] sm:$0xff] }
 0x1bb   : > { %v529_v24 = vld [vmem:[%s2353_s26 + $0xa78] sm:$0xff] }
 0x1bd   : > { %1784 = vmatpush1.bf16.xpose.msra.mxu0 %v1783_v46  ;;  %v1803_v46 = vpack.c.bf16 %v574_v38, %v570_v37  ;;  %v612_v37 = vld [vmem:[%s2353_s26 + $0xd10] sm:$0xff] }
 0x1be   : > { %1786 = vmatprep.subr.bf16.mxu0 %v1785_v48  ;;  %v1805_v48 = vpack.c.bf16 %v457_v42, %v453_v41  ;;  %v616_v38 = vld [vmem:[%s2353_s26 + $0xd30] sm:$0xff]  ;;  %v621_v41 = vld [vmem:[%s2353_s26 + $0xd58] sm:$0xff] }
 0x1bf   : > { %1912 = vmatpush1.bf16.xpose.msra.mxu1 %v1911_v47  ;;  %v1931_v47 = vpack.c.bf16 %v702_v40, %v698_v39  ;;  %v493_v39 = vld [vmem:[%s2353_s26 + $0x958] sm:$0xff] }
 0x1c0   : > { %1914 = vmatprep.subr.bf16.mxu1 %v1913_v49  ;;  %v1933_v49 = vpack.c.bf16 %v585_v45, %v581_v44  ;;  %v497_v40 = vld [vmem:[%s2353_s26 + $0x978] sm:$0xff]  ;;  %v1951_v45 = vpack.c.bf16 %v616_v38, %v612_v37 }
 0x1c1   : > { %v625_v42 = vld [vmem:[%s2353_s26 + $0xd78] sm:$0xff] }
 0x1c2   : > { %v533_v37 = vld [vmem:[%s2353_s26 + $0xa98] sm:$0xff] }
 0x1c3   : > { %v537_v38 = vld [vmem:[%s2353_s26 + $0xab8] sm:$0xff] }
 0x1c5   : > { %1788 = vmatpush1.bf16.xpose.msra.mxu0 %v1787_v57  ;;  %v1807_v57 = vpack.c.bf16 %v456_v50, %v452_v17  ;;  %v620_v17 = vld [vmem:[%s2353_s26 + $0xd50] sm:$0xff] }
 0x1c6   : > { %1790 = vmatprep.subr.bf16.mxu0 %v1789_v59  ;;  %v1809_v59 = vpack.c.bf16 %v465_v54, %v461_v53  ;;  %v624_v50 = vld [vmem:[%s2353_s26 + $0xd70] sm:$0xff]  ;;  %v629_v53 = vld [vmem:[%s2353_s26 + $0xd98] sm:$0xff] }
 0x1c7   : > { %1916 = vmatpush1.bf16.xpose.msra.mxu1 %v1915_v58  ;;  %v1935_v58 = vpack.c.bf16 %v584_v52, %v580_v51  ;;  %v501_v51 = vld [vmem:[%s2353_s26 + $0x998] sm:$0xff] }
 0x1c8   : > { %1918 = vmatprep.subr.bf16.mxu1 %v1917_v60  ;;  %v1937_v60 = vpack.c.bf16 %v593_v56, %v589_v55  ;;  %v505_v52 = vld [vmem:[%s2353_s26 + $0x9b8] sm:$0xff]  ;;  %v1955_v56 = vpack.c.bf16 %v624_v50, %v620_v17  ;;  %v2190_v17 = vmov 1966171168  }
 0x1c9   : > { %v633_v54 = vld [vmem:[%s2353_s26 + $0xdb8] sm:$0xff]  ;;  %v1309_v50 = vunpack.c.l.s4 %v2190_v17 }
 0x1ca   : > { %v701_v17 = vld [vmem:[%s2353_s26 + $0xfd8] sm:$0xff] }
 0x1cd   : > { %1792 = vmatpush1.bf16.xpose.msra.mxu0 %v1791_v5  ;;  %v1939_v5 = vpack.c.bf16 %v592_v0, %v588_v63  ;;  %v509_v63 = vld [vmem:[%s2353_s26 + $0x9d8] sm:$0xff] }
 0x1ce   : > { %1794 = vmatprep.subr.bf16.mxu0 %v1793_v7  ;;  %v1941_v7 = vpack.c.bf16 %v601_v4, %v597_v2  ;;  %v513_v0 = vld [vmem:[%s2353_s26 + $0x9f8] sm:$0xff] }
 0x1cf   : > { %1920 = vmatpush1.bf16.xpose.msra.mxu1 %v1919_v6  ;;  %v1813_v6 = vpack.c.bf16 %v473_v18, %v469_v1  ;;  %v637_v1 = vld [vmem:[%s2353_s26 + $0xdd8] sm:$0xff] }
 0x1d0   : > { %1922 = vmatprep.subr.bf16.mxu1 %v1921_v8  ;;  %v468_v8 = vld [vmem:[%s2353_s26 + $0x890] sm:$0xff]  ;;  %v641_v18 = vld [vmem:[%s2353_s26 + $0xdf8] sm:$0xff] }
 0x1d1   : > { %v1815_v15 = vpack.c.bf16 %v472_v9, %v468_v8  ;;  %v636_v8 = vld [vmem:[%s2353_s26 + $0xdd0] sm:$0xff] }
 0x1d2   : > { %v640_v9 = vld [vmem:[%s2353_s26 + $0xdf0] sm:$0xff] }
 0x1d5   : > { %1796 = vmatpush1.bf16.xpose.msra.mxu0 %v1795_v19 }
 0x1d6   : > { %1798 = vmatprep.subr.bf16.mxu0 %v1797_v21  ;;  %v476_v21 = vld [vmem:[%s2353_s26 + $0x8d0] sm:$0xff] }
 0x1d7   : > { %1924 = vmatpush1.bf16.xpose.msra.mxu1 %v1923_v20  ;;  %v1945_v20 = vpack.c.bf16 %v609_v14, %v605_v13  ;;  %v1963_v14 = vpack.c.bf16 %v640_v9, %v636_v8 }
 0x1d8   : > { %1926 = vmatprep.subr.bf16.mxu1 %v1925_v22  ;;  %v480_v22 = vld [vmem:[%s2353_s26 + $0x8f0] sm:$0xff] }
 0x1d9   : > { %v1819_v30 = vpack.c.bf16 %v480_v22, %v476_v21  ;;  %v644_v21 = vld [vmem:[%s2353_s26 + $0xe10] sm:$0xff] }
 0x1da   : > { %v648_v22 = vld [vmem:[%s2353_s26 + $0xe30] sm:$0xff] }
 0x1dd   : > { %1800 = vmatpush1.bf16.xpose.msra.mxu0 %v1799_v33  ;;  %v1821_v33 = vpack.c.bf16 %v489_v27, %v485_v26  ;;  %v653_v26 = vld [vmem:[%s2353_s26 + $0xe58] sm:$0xff] }
 0x1de   : > { %1802 = vmatprep.subr.bf16.mxu0 %v1801_v35  ;;  %v484_v35 = vld [vmem:[%s2353_s26 + $0x910] sm:$0xff]  ;;  %v657_v27 = vld [vmem:[%s2353_s26 + $0xe78] sm:$0xff] }
 0x1df   : > { %1928 = vmatpush1.bf16.xpose.msra.mxu1 %v1927_v34  ;;  %v1949_v34 = vpack.c.bf16 %v617_v29, %v613_v28  ;;  %v1967_v29 = vpack.c.bf16 %v648_v22, %v644_v21  ;;  %v557_v21 = vld [vmem:[%s2353_s26 + $0xb58] sm:$0xff] }
 0x1e0   : > { %1930 = vmatprep.subr.bf16.mxu1 %v1929_v36  ;;  %v488_v36 = vld [vmem:[%s2353_s26 + $0x930] sm:$0xff]  ;;  %v561_v22 = vld [vmem:[%s2353_s26 + $0xb78] sm:$0xff] }
 0x1e1   : > { %v1823_v44 = vpack.c.bf16 %v488_v36, %v484_v35  ;;  %v652_v35 = vld [vmem:[%s2353_s26 + $0xe50] sm:$0xff] }
 0x1e2   : > { %v656_v36 = vld [vmem:[%s2353_s26 + $0xe70] sm:$0xff] }
 0x1e5   : > { %1804 = vmatpush1.bf16.xpose.msra.mxu0 %v1803_v46  ;;  %v1825_v46 = vpack.c.bf16 %v497_v40, %v493_v39  ;;  %v661_v39 = vld [vmem:[%s2353_s26 + $0xe98] sm:$0xff] }
 0x1e6   : > { %1806 = vmatprep.subr.bf16.mxu0 %v1805_v48  ;;  %v492_v48 = vld [vmem:[%s2353_s26 + $0x950] sm:$0xff]  ;;  %v665_v40 = vld [vmem:[%s2353_s26 + $0xeb8] sm:$0xff] }
 0x1e7   : > { %1932 = vmatpush1.bf16.xpose.msra.mxu1 %v1931_v47  ;;  %v1953_v47 = vpack.c.bf16 %v625_v42, %v621_v41  ;;  %v1971_v42 = vpack.c.bf16 %v656_v36, %v652_v35  ;;  %v565_v35 = vld [vmem:[%s2353_s26 + $0xb98] sm:$0xff] }
 0x1e8   : > { %1934 = vmatprep.subr.bf16.mxu1 %v1933_v49  ;;  %v496_v49 = vld [vmem:[%s2353_s26 + $0x970] sm:$0xff]  ;;  %v569_v36 = vld [vmem:[%s2353_s26 + $0xbb8] sm:$0xff] }
 0x1e9   : > { %v1827_v55 = vpack.c.bf16 %v496_v49, %v492_v48  ;;  %v660_v48 = vld [vmem:[%s2353_s26 + $0xe90] sm:$0xff] }
 0x1ea   : > { %v664_v49 = vld [vmem:[%s2353_s26 + $0xeb0] sm:$0xff] }
 0x1ec   : > { %1077 = vmatmul.mubr.f32.vlgmr.msra.gmra.mrb[2].mxu0 %v2510_v25 }
 0x1ed   : > { %1808 = vmatpush1.bf16.xpose.msra.mxu0 %v1807_v57  ;;  %1147 = vmatprep.mubr.f32.mxu0 %v2515_v32  ;;  %v1829_v57 = vpack.c.bf16 %v505_v52, %v501_v51  ;;  %v541_v51 = vld [vmem:[%s2353_s26 + $0xad8] sm:$0xff] }
 0x1ee   : > { %1219 = vmatmul.mubr.f32.vlgmr.msra.gmra.mrb[2].mxu1 %v2510_v25  ;;  %1810 = vmatprep.subr.bf16.mxu0 %v1809_v59  ;;  %v1811_v25 = vpack.c.bf16 %v464_v62, %v460_v61  ;;  %v500_v59 = vld [vmem:[%s2353_s26 + $0x990] sm:$0xff]  ;;  %v545_v52 = vld [vmem:[%s2353_s26 + $0xaf8] sm:$0xff] }
 0x1ef   : > { %1936 = vmatpush1.bf16.xpose.msra.mxu1 %v1935_v58  ;;  %1289 = vmatprep.mubr.f32.mxu1 %v2515_v32  ;;  %v481_v32 = vld [vmem:[%s2353_s26 + $0x8f8] sm:$0xff]  ;;  %v1957_v58 = vpack.c.bf16 %v633_v54, %v629_v53  ;;  %v628_v61 = vld [vmem:[%s2353_s26 + $0xd90] sm:$0xff] }
 0x1f0   : > { %1938 = vmatprep.subr.bf16.mxu1 %v1937_v60  ;;  %v1817_v19 = vpack.c.bf16 %v481_v32, %v477_v12  ;;  %v504_v60 = vld [vmem:[%s2353_s26 + $0x9b0] sm:$0xff]  ;;  %v645_v12 = vld [vmem:[%s2353_s26 + $0xe18] sm:$0xff] }
 0x1f1   : > { %v632_v62 = vld [vmem:[%s2353_s26 + $0xdb0] sm:$0xff]  ;;  %v1831_v2 = vpack.c.bf16 %v504_v60, %v500_v59  ;;  %v649_v32 = vld [vmem:[%s2353_s26 + $0xe38] sm:$0xff] }
 0x1f2   : > { %v1959_v4 = vpack.c.bf16 %v632_v62, %v628_v61  ;;  %v669_v53 = vld [vmem:[%s2353_s26 + $0xed8] sm:$0xff]  ;;  %v540_v60 = vld [vmem:[%s2353_s26 + $0xad0] sm:$0xff] }
 0x1f3   : > { %v673_v54 = vld [vmem:[%s2353_s26 + $0xef8] sm:$0xff]  ;;  %v544_v61 = vld [vmem:[%s2353_s26 + $0xaf0] sm:$0xff] }
 0x1f4   : > { %v1977_v59 = vpack.c.bf16 %v673_v54, %v669_v53  ;;  %v668_v62 = vld [vmem:[%s2353_s26 + $0xed0] sm:$0xff]  ;;  %v1851_v9 = vpack.c.bf16 %v544_v61, %v540_v60 }
 0x1f5   : > { %1812 = vmatpush1.bf16.xpose.msra.mxu0 %v1811_v25  ;;  %v1833_v25 = vpack.c.bf16 %v513_v0, %v509_v63 }
 0x1f6   : > { %1814 = vmatprep.subr.bf16.mxu0 %v1813_v6  ;;  %v508_v6 = vld [vmem:[%s2353_s26 + $0x9d0] sm:$0xff] }
 0x1f7   : > { %1940 = vmatpush1.bf16.xpose.msra.mxu1 %v1939_v5  ;;  %v1961_v5 = vpack.c.bf16 %v641_v18, %v637_v1  ;;  %v672_v1 = vld [vmem:[%s2353_s26 + $0xef0] sm:$0xff]  ;;  %v549_v18 = vld [vmem:[%s2353_s26 + $0xb18] sm:$0xff] }
 0x1f8   : > { %1942 = vmatprep.subr.bf16.mxu1 %v1941_v7  ;;  %v512_v7 = vld [vmem:[%s2353_s26 + $0x9f0] sm:$0xff] }
 0x1f9   : > { %v1835_v13 = vpack.c.bf16 %v512_v7, %v508_v6  ;;  %v681_v6 = vld [vmem:[%s2353_s26 + $0xf38] sm:$0xff] }
 0x1fd   : > { %1816 = vmatpush1.bf16.xpose.msra.mxu0 %v1815_v15  ;;  %v1837_v15 = vpack.c.bf16 %v521_v11, %v517_v10 }
 0x1fe   : > { %1818 = vmatprep.subr.bf16.mxu0 %v1817_v19  ;;  %v516_v19 = vld [vmem:[%s2353_s26 + $0xa10] sm:$0xff] }
 0x1ff   : > { %1944 = vmatpush1.bf16.xpose.msra.mxu1 %v1943_v16  ;;  %v1965_v16 = vpack.c.bf16 %v649_v32, %v645_v12 }
 0x200   : > { %1946 = vmatprep.subr.bf16.mxu1 %v1945_v20  ;;  %v520_v20 = vld [vmem:[%s2353_s26 + $0xa30] sm:$0xff] }
 0x201   : > { %v1839_v28 = vpack.c.bf16 %v520_v20, %v516_v19  ;;  %v676_v19 = vld [vmem:[%s2353_s26 + $0xf10] sm:$0xff] }
 0x202   : > { %v680_v20 = vld [vmem:[%s2353_s26 + $0xf30] sm:$0xff] }
 0x205   : > { %1820 = vmatpush1.bf16.xpose.msra.mxu0 %v1819_v30  ;;  %v1841_v30 = vpack.c.bf16 %v529_v24, %v525_v23  ;;  %v685_v23 = vld [vmem:[%s2353_s26 + $0xf58] sm:$0xff] }
 0x206   : > { %1822 = vmatprep.subr.bf16.mxu0 %v1821_v33  ;;  %v524_v33 = vld [vmem:[%s2353_s26 + $0xa50] sm:$0xff]  ;;  %v689_v24 = vld [vmem:[%s2353_s26 + $0xf78] sm:$0xff] }
 0x207   : > { %1948 = vmatpush1.bf16.xpose.msra.mxu1 %v1947_v31  ;;  %v1969_v31 = vpack.c.bf16 %v657_v27, %v653_v26  ;;  %v1983_v27 = vpack.c.bf16 %v680_v20, %v676_v19 }
 0x208   : > { %1950 = vmatprep.subr.bf16.mxu1 %v1949_v34  ;;  %v528_v34 = vld [vmem:[%s2353_s26 + $0xa70] sm:$0xff] }
 0x209   : > { %v1843_v41 = vpack.c.bf16 %v528_v34, %v524_v33  ;;  %v684_v33 = vld [vmem:[%s2353_s26 + $0xf50] sm:$0xff] }
 0x20a   : > { %v688_v34 = vld [vmem:[%s2353_s26 + $0xf70] sm:$0xff] }
 0x20d   : > { %1824 = vmatpush1.bf16.xpose.msra.mxu0 %v1823_v44  ;;  %v1845_v44 = vpack.c.bf16 %v537_v38, %v533_v37  ;;  %v693_v37 = vld [vmem:[%s2353_s26 + $0xf98] sm:$0xff] }
 0x20e   : > { %1826 = vmatprep.subr.bf16.mxu0 %v1825_v46  ;;  %v532_v46 = vld [vmem:[%s2353_s26 + $0xa90] sm:$0xff]  ;;  %v697_v38 = vld [vmem:[%s2353_s26 + $0xfb8] sm:$0xff] }
 0x20f   : > { %1952 = vmatpush1.bf16.xpose.msra.mxu1 %v1951_v45  ;;  %v1973_v45 = vpack.c.bf16 %v665_v40, %v661_v39  ;;  %v1987_v40 = vpack.c.bf16 %v688_v34, %v684_v33 }
 0x210   : > { %1954 = vmatprep.subr.bf16.mxu1 %v1953_v47  ;;  %v536_v47 = vld [vmem:[%s2353_s26 + $0xab0] sm:$0xff] }
 0x215   : > { %1828 = vmatpush1.bf16.xpose.msra.mxu0 %v1827_v55  ;;  %v1847_v55 = vpack.c.bf16 %v536_v47, %v532_v46  ;;  %v692_v46 = vld [vmem:[%s2353_s26 + $0xf90] sm:$0xff] }
 0x216   : > { %1830 = vmatprep.subr.bf16.mxu0 %v1829_v57  ;;  %v1849_v57 = vpack.c.bf16 %v545_v52, %v541_v51  ;;  %v696_v47 = vld [vmem:[%s2353_s26 + $0xfb0] sm:$0xff] }
 0x217   : > { %1956 = vmatpush1.bf16.xpose.msra.mxu1 %v1955_v56  ;;  %v1975_v56 = vpack.c.bf16 %v664_v49, %v660_v48  ;;  %v573_v48 = vld [vmem:[%s2353_s26 + $0xbd8] sm:$0xff]  ;;  %v1991_v52 = vpack.c.bf16 %v696_v47, %v692_v46 }
 0x218   : > { %1958 = vmatprep.subr.bf16.mxu1 %v1957_v58  ;;  %v1310_v58 = vunpack.c.0.s8 %v1309_v50  ;;  %v577_v49 = vld [vmem:[%s2353_s26 + $0xbf8] sm:$0xff] }
 0x219   : > { %v705_v50 = vld [vmem:[%s2353_s26 + $0xff8] sm:$0xff]  ;;  %v1865_v53 = vpack.c.bf16 %v577_v49, %v573_v48 }
 0x21a   : > { %v2873_v0 = vsub.s32 %v1310_v58, %v2403_v3  ;;  %v1979_v3 = vpack.c.bf16 %v672_v1, %v668_v62  ;;  %v1993_v54 = vpack.c.bf16 %v705_v50, %v701_v17  ;;  %v704_v58 = vld [vmem:[%s2353_s26 + $0xff0] sm:$0xff] }
 0x21d   : > { %1832 = vmatpush1.bf16.xpose.msra.mxu0 %v1831_v2  ;;  %v553_v2 = vld [vmem:[%s2353_s26 + $0xb38] sm:$0xff] }
 0x21e   : > { %1834 = vmatprep.subr.bf16.mxu0 %v1833_v25  ;;  %v1853_v11 = vpack.c.bf16 %v553_v2, %v549_v18 }
 0x21f   : > { %1960 = vmatpush1.bf16.xpose.msra.mxu1 %v1959_v4 }
 0x220   : > { %1962 = vmatprep.subr.bf16.mxu1 %v1961_v5  ;;  %v677_v5 = vld [vmem:[%s2353_s26 + $0xf18] sm:$0xff] }
 0x221   : > { %v1981_v32 = vpack.c.bf16 %v681_v6, %v677_v5 }
 0x225   : > { %1836 = vmatpush1.bf16.xpose.msra.mxu0 %v1835_v13 }
 0x226   : > { %1838 = vmatprep.subr.bf16.mxu0 %v1837_v15  ;;  %v548_v15 = vld [vmem:[%s2353_s26 + $0xb10] sm:$0xff] }
 0x227   : > { %1964 = vmatpush1.bf16.xpose.msra.mxu1 %v1963_v14 }
 0x228   : > { %1966 = vmatprep.subr.bf16.mxu1 %v1965_v16  ;;  %v552_v16 = vld [vmem:[%s2353_s26 + $0xb30] sm:$0xff] }
 0x229   : > { %v1855_v26 = vpack.c.bf16 %v552_v16, %v548_v15 }
 0x22d   : > { %1840 = vmatpush1.bf16.xpose.msra.mxu0 %v1839_v28  ;;  %v1857_v28 = vpack.c.bf16 %v561_v22, %v557_v21 }
 0x22e   : > { %1842 = vmatprep.subr.bf16.mxu0 %v1841_v30  ;;  %v556_v30 = vld [vmem:[%s2353_s26 + $0xb50] sm:$0xff] }
 0x22f   : > { %1968 = vmatpush1.bf16.xpose.msra.mxu1 %v1967_v29  ;;  %v1985_v29 = vpack.c.bf16 %v689_v24, %v685_v23 }
 0x230   : > { %1970 = vmatprep.subr.bf16.mxu1 %v1969_v31  ;;  %v560_v31 = vld [vmem:[%s2353_s26 + $0xb70] sm:$0xff] }
 0x231   : > { %v1859_v39 = vpack.c.bf16 %v560_v31, %v556_v30 }
 0x235   : > { %1844 = vmatpush1.bf16.xpose.msra.mxu0 %v1843_v41  ;;  %v1861_v41 = vpack.c.bf16 %v569_v36, %v565_v35 }
 0x236   : > { %1846 = vmatprep.subr.bf16.mxu0 %v1845_v44  ;;  %v564_v44 = vld [vmem:[%s2353_s26 + $0xb90] sm:$0xff] }
 0x237   : > { %1972 = vmatpush1.bf16.xpose.msra.mxu1 %v1971_v42  ;;  %v1989_v42 = vpack.c.bf16 %v697_v38, %v693_v37 }
 0x238   : > { %1974 = vmatprep.subr.bf16.mxu1 %v1973_v45  ;;  %v568_v45 = vld [vmem:[%s2353_s26 + $0xbb0] sm:$0xff] }
 0x239   : > { %v1863_v51 = vpack.c.bf16 %v568_v45, %v564_v44 }
 0x23d   : > { %1848 = vmatpush1.bf16.xpose.msra.mxu0 %v1847_v55  ;;  %v572_v55 = vld [vmem:[%s2353_s26 + $0xbd0] sm:$0xff] }
 0x23e   : > { %1850 = vmatprep.subr.bf16.mxu0 %v1849_v57  ;;  %v700_v57 = vld [vmem:[%s2353_s26 + $0xfd0] sm:$0xff] }
 0x23f   : > { %1976 = vmatpush1.bf16.xpose.msra.mxu1 %v1975_v56  ;;  %v865_v63 = vpop.f32.mrb[0].mxu0  ;;  %v576_v56 = vld [vmem:[%s2353_s26 + $0xbf0] sm:$0xff]  ;;  %v1995_v60 = vpack.c.bf16 %v704_v58, %v700_v57 }
 0x240   : > { %1978 = vmatprep.subr.bf16.mxu1 %v1977_v59  ;;  %v867_v25 = vpop.f32.mrb[1].mxu0  ;;  %v1867_v59 = vpack.c.bf16 %v576_v56, %v572_v55 }
 0x241   : > { %v1007_v4 = vpop.f32.mrb[0].mxu1  ;;  %v1304_v7 = vcombine.low %v865_v63, %v867_v25 }
 0x242   : > { %v1009_v8 = vpop.f32.mrb[1].mxu1 }
 0x243   : > { %v1305_v10 = vcombine.low %v1007_v4, %v1009_v8  ;;  %v2881_v12 = vrot.slane %v1304_v7, %v2873_v0 }
 0x245   : > { %v2884_v13 = vrot.slane %v1305_v10, %v2873_v0  ;;  %1852 = vmatpush1.bf16.xpose.msra.mxu0 %v1851_v9 }
 0x246   : > { %1854 = vmatprep.subr.bf16.mxu0 %v1853_v11 }
 0x247   : > { %v1336_v14 = vcombine.low %v2881_v12, %v2884_v13  ;;  %1980 = vmatpush1.bf16.xpose.msra.mxu1 %v1979_v3 }
 0x248   : > { %1982 = vmatprep.subr.bf16.mxu1 %v1981_v32 }
 0x249   : > { %v1344_v6 = vrot.slane %v1336_v14, %v2873_v0 }
 0x24d   : > { %1856 = vmatpush1.bf16.xpose.msra.mxu0 %v1855_v26 }
 0x24e   : > { %1858 = vmatprep.subr.bf16.mxu0 %v1857_v28 }
 0x24f   : > { %1984 = vmatpush1.bf16.xpose.msra.mxu1 %v1983_v27 }
 0x250   : > { %1986 = vmatprep.subr.bf16.mxu1 %v1985_v29 }
 0x255   : > { %1860 = vmatpush1.bf16.xpose.msra.mxu0 %v1859_v39 }
 0x256   : > { %1862 = vmatprep.subr.bf16.mxu0 %v1861_v41 }
 0x257   : > { %1988 = vmatpush1.bf16.xpose.msra.mxu1 %v1987_v40 }
 0x258   : > { %1990 = vmatprep.subr.bf16.mxu1 %v1989_v42 }
 0x25d   : > { %1864 = vmatpush1.bf16.xpose.msra.mxu0 %v1863_v51 }
 0x25e   : > { %1866 = vmatprep.subr.bf16.mxu0 %v1865_v53 }
 0x25f   : > { %1992 = vmatpush1.bf16.xpose.msra.mxu1 %v1991_v52 }
 0x260   : > { %1994 = vmatprep.subr.bf16.mxu1 %v1993_v54 }
 0x265   : > { %1868 = vmatpush1.bf16.xpose.msra.mxu0 %v1867_v59 }
 0x267   : > { %1996 = vmatpush1.bf16.xpose.msra.mxu1 %v1995_v60 }
 0x26c   : > { %1148 = vmatmul.mubr.f32.vlgmr.msra.gmra.mrb[2].mxu0 %v2649_v43 }
 0x26e   : > { %1290 = vmatmul.mubr.f32.vlgmr.msra.gmra.mrb[2].mxu1 %v2649_v43 }
 0x33f   : > { %v1149_v61 = vpop.f32.mrb[2].mxu0 }
 0x340   : > { %v1151_v63 = vpop.f32.mrb[3].mxu0 }
 0x341   : > { %v1291_v62 = vpop.f32.mrb[2].mxu1  ;;  %v1306_v1 = vcombine.low %v1149_v61, %v1151_v63 }
 0x342   : > { %v1293_v18 = vpop.f32.mrb[3].mxu1 }
 0x343   : > { %v1307_v2 = vcombine.low %v1291_v62, %v1293_v18  ;;  %v1328_v4 = vrot.slane %v1306_v1, %v2873_v0 }
 0x345   : > { %v1335_v25 = vrot.slane %v1307_v2, %v2873_v0 }
 0x347   : > { %v1337_v5 = vcombine.low %v1328_v4, %v1335_v25  ;;  %1362 = sbr.rel (!%p2999_p9) target bundleno = 873 (0x369), region = 40 }
 0x349   : > { %v1351_v43 = vrot.slane %v1337_v5, %v2873_v0 }
 0x34b   : > { %v1352_v7 = vcombine.low %v1344_v6, %v1351_v43 }
 0x34d   : > { %1354 = vst [vmem:[%s182_s23] sm:$0xff] %v1352_v7 }
 0x34e   : > { %s3008_s4 = smov (!%p1365_p10, %s1364_s4), 8 }
 0x34f   : > { %s2930_s7 = sshll.u32 %s3008_s4, 4 }
 0x350   : > { %s1369_s8 = ssub.s32 128, %s2930_s7 }
 0x351   : > { %1370 = vsyncadd %s1356_s27, %s1369_s8  ;;  %p1477_p1 = scmp.ne.s32.totalorder %s2930_s7, 0  ;;  %s1484_s14 = sshll.u32 %s2228_s13, 7 }
 0x352   : > { %s2940_s17 = scalar_lea.hbm %s2984_s2, %s1484_s14  ;;  %s1375_s24 = sshll.u32 %s182_s23, 4  ;;  %s1376_s24 = int_to_ptr.vmem [resolvable:$true] %s1375_s24 }
 0x353   : > { %s2114_s25 = scalar_lea.vmem %s1376_s24, %s2930_s7  ;;  %s2191_s28 = smov [#allocation7]  }
 0x354   : > { %p2115_p7 = scmp.ne.s32.totalorder %s1376_s24, %s2114_s25  ;;  %s2118_s19 = sshll.u32 %s2191_s28, 4  ;;  %s2119_s19 = int_to_ptr.vmem [resolvable:$false] %s2118_s19 }
 0x355   : > { %s2120_s29 = scalar_lea.vmem %s2119_s19, 256  ;;  %p2121_p11 = scmp.lt.s32.totalorder %s1376_s24, %s2119_s19 }
 0x356   : > { %p2116_p4 = pnand %p2115_p7, %p1477_p1  ;;  %p2122_p13 = scmp.lt.s32.totalorder %s2120_s29, %s2114_s25 }
 0x358   : > { %p2117_p6 = pneg %p2116_p4  ;;  %p2123_p2 = por %p2122_p13, %p2121_p11 }
 0x35a   : > { %p2124_p12 = pnand %p2123_p2, %p2117_p6 }
 0x35c   : > { %2127 = shalt.err (!%p2124_p12)
}
 0x35d   : > { %s2128_s13 = scalar_lea.hbm %s2940_s17, %s2930_s7  ;;  %s2132_s26 = scalar_lea.hbm %s2984_s2, 192 }
 0x35e   : > { %p2129_p3 = scmp.ne.s32.totalorder %s2940_s17, %s2128_s13  ;;  %p2133_p9 = scmp.lt.u32.totalorder %s2940_s17, %s2984_s2 }
 0x35f   : > { %p2134_p10 = scmp.lt.u32.totalorder %s2132_s26, %s2128_s13  ;;  %p2136_p4 = scmp.lt.u32.totalorder %s2128_s13, %s2940_s17 }
 0x360   : > { %p2130_p8 = pnand %p2129_p3, %p1477_p1 }
 0x361   : > { %p2135_p7 = por %p2134_p10, %p2133_p9 }
 0x362   : > { %p2131_p5 = pneg %p2130_p8 }
 0x363   : > { %p2137_p6 = por %p2136_p4, %p2135_p7 }
 0x365   : > { %p2138_p11 = pnand %p2137_p6, %p2131_p5 }
 0x367   : > { %2141 = shalt.err (!%p2138_p11)
}
 0x368   : > { %1378 = dma.vmem_to_hbm [thread:$0]  (%p1477_p1), %s1376_s24, %s2930_s7, %s2940_s17, %s1356_s27  }
 0x369 PF: > { %s1387_s3 = sand.u32 1, %s2172_s9   ;;  %p3000_p13 = scmp.ne.s32.totalorder %s2991_s22, 0 }
 0x36a   : > { %s1388_s4 = scalar_lea.sflag [#allocation4], %s1387_s3 }
 0x36b   : > { %p2016_p2 = pnand %p1460_p0, %p3000_p13 }
 0x36d   : > { %2167 = dma.done.wait (!%p2016_p2), %s1388_s4, 128  }
 0x36e   : > { %2169 = vsyncadd (!%p2016_p2), %s1388_s4, 4294967168  ;;  %p16_p12 = scmp.ge.s32.totalorder %s2232_s15, 4   ;;  %s3001_s9 = smov %s2176_s10 }
 0x36f   : > { %s3002_s10 = smov %s2180_s11  ;;  %s3003_s11 = smov %s2244_s18 }
 0x370   : > { %s3004_s12 = smov %s2232_s15  ;;  %18 = sbr.rel (!%p16_p12) target bundleno = 6 (0x6), region = 78 }
 0x377   :  { %1393 = vsyncpa [#allocation3], 1 }
 0x378   :  { %1395 = vsyncpa [#allocation3 + $0x1], 1 }
 0x379   :  { %1396 = vsyncpa [#allocation6], 1 }
 0x37a   :  { %1398 = vsyncpa [#allocation6 + $0x1], 1 }
 0x37b   :  { %1399 = vsyncpa [#allocation4], 1 }
 0x37c   :  { %1401 = vsyncpa [#allocation4 + $0x1], 1 }

</bundles_post_ra>
